<compile_context>
chip_gen: v7x
topology: tpu7x:2x2x1
jax: 0.10.0
libtpu: 0.0.40
codegen_flags: <defaults>
</compile_context>

<pallas_src>
import functools

import jax
import jax.numpy as jnp
from jax.experimental import pallas as pl
from jax.experimental.pallas import tpu as pltpu


_EPS = 1e-5                    # torch.nn.LayerNorm default eps
_SUBLANE = 8                   # f32 sublane tile
_LANE = 128                    # lane width
_MAX_BATCH_TILE = 2048         # rows per grid step (sweep 1024/2048/4096)
_VMEM_LIMIT = 32 * 1024 * 1024
_PREC = jax.lax.Precision.HIGHEST


def _round_up(v, m):
    return ((v + m - 1) // m) * m


def _cdiv(a, b):
    return -(-a // b)


# ---------------------------------------------------------------------------
# The single fused forward kernel
# ---------------------------------------------------------------------------
def _macro_forward_kernel(x_ref, vec_ref, *refs,
                          n_layers, vec_offsets, vec_sizes):
    """refs = (<matrix refs in canonical order>, out_ref).

    Canonical matrix order:
      w_in, M_in,
      per macro layer i: W1_pack, M_seg_i, W2_pack, (if not last: Wc_i, Mc_i),
      w_out
    Canonical vector order (static offsets into the vec slab):
      b_in, g_in, bt_in,
      per macro layer i: b1, g1, bt1, b2, (if not last: bc, gc, btc),
      b_out
    """
    out_ref = refs[-1]
    mat_it = iter(refs[:-1])
    vec_it = iter(zip(vec_offsets, vec_sizes))

    def mat():
        return next(mat_it)[...]

    def vec():
        off, d = next(vec_it)
        return vec_ref[:, off:off + d]          # static lane slice of the slab

    def dot(a, b):
        return jnp.dot(a, b, precision=_PREC,
                       preferred_element_type=jnp.float32)

    def layernorm(y, avg_mat, g, bt):
        # LayerNorm statistics on the MXU: avg_mat broadcasts each row's
        # (segment-)mean back across the lanes of its segment.
        mean = dot(y, avg_mat)
        d = y - mean
        var = dot(d * d, avg_mat)
        return d * jax.lax.rsqrt(var + _EPS) * g + bt

    x = x_ref[...]                               # (TB, num_inputs)

    # Input: Linear -> LayerNorm -> ReLU
    h = dot(x, mat()) + vec()
    h = jnp.maximum(layernorm(h, mat(), vec(), vec()), 0.0)

    for li in range(n_layers):
        # MacroLayer: block-diag Linear -> per-cell LayerNorm -> ReLU
        #             -> block-diag Linear
        z = dot(h, mat()) + vec()
        z = jnp.maximum(layernorm(z, mat(), vec(), vec()), 0.0)
        h = dot(z, mat()) + vec()
        if li < n_layers - 1:
            # Connective Linear -> LayerNorm -> ReLU
            h = dot(h, mat()) + vec()
            h = jnp.maximum(layernorm(h, mat(), vec(), vec()), 0.0)

    # Output: Linear -> tanh (lane-narrow: num_outputs wide)
    out_ref[...] = jnp.tanh(dot(h, mat()) + vec())


# ---------------------------------------------------------------------------
# Deterministic parameter initialization (synthetic; mimics nn.Linear bounds)
# ---------------------------------------------------------------------------
def init_linear(key, d_in, d_out):
    kw, kb = jax.random.split(key)
    bound = 1.0 / jnp.sqrt(jnp.float32(d_in))
    w = jax.random.uniform(kw, (d_in, d_out), jnp.float32, -bound, bound)
    b = jax.random.uniform(kb, (1, d_out), jnp.float32, -bound, bound)
    return w, b


def init_layernorm(d):
    return jnp.ones((1, d), jnp.float32), jnp.zeros((1, d), jnp.float32)


def init_cell(key, d_in, hidden, d_out):
    """EvolvableMLPCell: Linear(d_in,hidden) -> LN -> ReLU -> Linear(hidden,d_out)."""
    k1, k2 = jax.random.split(key)
    w1, b1 = init_linear(k1, d_in, hidden)
    g1, bt1 = init_layernorm(hidden)
    w2, b2 = init_linear(k2, hidden, d_out)
    return {"w1": w1, "b1": b1, "g1": g1, "bt1": bt1, "w2": w2, "b2": b2}


def _full_avg_matrix(d):
    """(d, d) matrix that maps a row to its mean broadcast over all lanes."""
    return jnp.full((d, d), 1.0 / float(d), jnp.float32)


def _segment_avg_matrix(seg_sizes):
    """Block-diagonal averaging matrix: 1/seg within each segment's block."""
    D = sum(seg_sizes)
    M = jnp.zeros((D, D), jnp.float32)
    off = 0
    for s in seg_sizes:
        M = M.at[off:off + s, off:off + s].set(1.0 / float(s))
        off += s
    return M


def _build_vec_slab(vectors):
    """Concatenate (1, D) vectors into one slab; each slot padded to 128 lanes."""
    parts, offsets, sizes = [], [], []
    off = 0
    for v in vectors:
        d = v.shape[-1]
        pad = _round_up(d, _LANE)
        parts.append(jnp.pad(v.reshape(1, d), ((0, 0), (0, pad - d))))
        offsets.append(off)
        sizes.append(d)
        off += pad
    return jnp.concatenate(parts, axis=-1), tuple(offsets), tuple(sizes)


# ---------------------------------------------------------------------------
# EvolvableMacroNetwork (synthetic instance)
# ---------------------------------------------------------------------------
class EvolvableMacroNetworkPallas:
    """Synthetic macro-network:
         num_inputs=16, num_outputs=4, activation='relu',
         output_activation='tanh', layer_norm=True, output_vanish=False.
       Two MacroLayers of two cells each (uniform cell hidden width):
         layer0: cells with (in, hidden, out) = (12, 32, 10), (12, 32, 10)
         layer1: cells with (in, hidden, out) = (8,  32, 6),  (16, 32, 6)
    """
    # TODO(synk): evolutionary/mutation/cloning methods of the module have no
    # forward-pass semantics and are not implemented here.

    def __init__(self, key, num_inputs=16, num_outputs=4, cell_hidden=32):
        self.num_inputs = num_inputs
        self.num_outputs = num_outputs
        self.cell_hidden = cell_hidden
        self.layer_cfg = [
            [(12, cell_hidden, 10), (12, cell_hidden, 10)],   # MacroLayer 0
            [(8, cell_hidden, 6), (16, cell_hidden, 6)],      # MacroLayer 1
        ]
        keys = iter(jax.random.split(key, 32))

        layer0_in = sum(c[0] for c in self.layer_cfg[0])
        self.w_in, self.b_in = init_linear(next(keys), num_inputs, layer0_in)
        self.g_in, self.bt_in = init_layernorm(layer0_in)

        # per-cell params (for the pure-JAX reference) and packed versions
        self.cells = []
        for cfg in self.layer_cfg:
            self.cells.append([init_cell(next(keys), ci, h, co)
                               for (ci, h, co) in cfg])
        self.packed_layers = [self._pack_layer(cfg, cells)
                              for cfg, cells in zip(self.layer_cfg, self.cells)]

        # connective linear + layernorm between macro layers
        self.connect = []
        for i in range(len(self.layer_cfg) - 1):
            d_out_i = sum(c[2] for c in self.layer_cfg[i])
            d_in_next = sum(c[0] for c in self.layer_cfg[i + 1])
            w, b = init_linear(next(keys), d_out_i, d_in_next)
            g, bt = init_layernorm(d_in_next)
            self.connect.append((w, b, g, bt))

        last_out = sum(c[2] for c in self.layer_cfg[-1])
        self.w_out, self.b_out = init_linear(next(keys), last_out, num_outputs)

        self._build_flat_params()

    # -- pack one MacroLayer's cells into block-diagonal matmuls -------------
    def _pack_layer(self, cfg, cells):
        h = self.cell_hidden
        sum_in = sum(c[0] for c in cfg)
        sum_out = sum(c[2] for c in cfg)
        W1 = jnp.zeros((sum_in, len(cfg) * h), jnp.float32)
        W2 = jnp.zeros((len(cfg) * h, sum_out), jnp.float32)
        b1, g1, bt1, b2 = [], [], [], []
        off_in = off_out = 0
        for c, ((ci, _, co), p) in enumerate(zip(cfg, cells)):
            W1 = W1.at[off_in:off_in + ci, c * h:(c + 1) * h].set(p["w1"])
            W2 = W2.at[c * h:(c + 1) * h, off_out:off_out + co].set(p["w2"])
            b1.append(p["b1"]); g1.append(p["g1"])
            bt1.append(p["bt1"]); b2.append(p["b2"])
            off_in += ci
            off_out += co
        return (W1,
                jnp.concatenate(b1, axis=-1),
                jnp.concatenate(g1, axis=-1),
                jnp.concatenate(bt1, axis=-1),
                W2,
                jnp.concatenate(b2, axis=-1))

    # -- canonical matrix list + single vector slab ---------------------------
    def _build_flat_params(self):
        layer0_in = sum(c[0] for c in self.layer_cfg[0])
        matrices = [self.w_in, _full_avg_matrix(layer0_in)]
        vectors = [self.b_in, self.g_in, self.bt_in]
        for li, cfg in enumerate(self.layer_cfg):
            W1, b1, g1, bt1, W2, b2 = self.packed_layers[li]
            matrices += [W1, _segment_avg_matrix([c[1] for c in cfg]), W2]
            vectors += [b1, g1, bt1, b2]
            if li < len(self.layer_cfg) - 1:
                wc, bc, gc, btc = self.connect[li]
                d_in_next = sum(c[0] for c in self.layer_cfg[li + 1])
                matrices += [wc, _full_avg_matrix(d_in_next)]
                vectors += [bc, gc, btc]
        matrices.append(self.w_out)
        vectors.append(self.b_out)

        self.matrices = matrices
        self.vec_slab, self.vec_offsets, self.vec_sizes = _build_vec_slab(vectors)

    # -- batch tile selection --------------------------------------------------
    @staticmethod
    def _pick_tile(B):
        b8 = _round_up(max(B, 1), _SUBLANE)
        if b8 <= _SUBLANE:
            return _SUBLANE, _SUBLANE                      # tiny batch: 1 tile
        if b8 <= 2 * _MAX_BATCH_TILE:
            tb = _round_up(_cdiv(b8, 2), _SUBLANE)         # >=2 steps (v7x 2 TCs)
            return tb, 2 * tb
        n_tiles = _cdiv(b8, _MAX_BATCH_TILE)               # balanced, no 2x waste
        tb = _round_up(_cdiv(b8, n_tiles), _SUBLANE)
        return tb, n_tiles * tb

    # -- fused Pallas forward --------------------------------------------------
    def forward(self, x):
        x = jnp.asarray(x, jnp.float32)
        B = x.shape[0]
        tb, b_pad = self._pick_tile(B)
        if b_pad != B:
            x = jnp.pad(x, ((0, b_pad - B), (0, 0)))

        in_specs = [pl.BlockSpec((tb, self.num_inputs), lambda i: (i, 0)),
                    pl.BlockSpec(self.vec_slab.shape, lambda i: (0, 0))]
        # Weight matrices: full array every grid step (resident in VMEM).
        in_specs += [pl.BlockSpec(m.shape, lambda i: (0, 0))
                     for m in self.matrices]
        out_spec = pl.BlockSpec((tb, self.num_outputs), lambda i: (i, 0))

        kernel = functools.partial(
            _macro_forward_kernel,
            n_layers=len(self.layer_cfg),
            vec_offsets=self.vec_offsets,
            vec_sizes=self.vec_sizes,
        )

        y = pl.pallas_call(
            kernel,
            out_shape=jax.ShapeDtypeStruct((b_pad, self.num_outputs),
                                           jnp.float32),
            grid=(b_pad // tb,),
            in_specs=in_specs,
            out_specs=out_spec,
            compiler_params=pltpu.CompilerParams(
                dimension_semantics=("parallel",),
                vmem_limit_bytes=_VMEM_LIMIT),
        )(x, self.vec_slab, *self.matrices)
        return y[:B]

    # -- pure-JAX reference (per-cell split/concat, torch semantics) ----------
    def reference_forward(self, x):
        def mm(a, b):
            return jnp.dot(a, b, precision=_PREC)

        def ln(y, g, bt):
            mean = jnp.mean(y, axis=-1, keepdims=True)
            var = jnp.mean((y - mean) ** 2, axis=-1, keepdims=True)
            return (y - mean) * jax.lax.rsqrt(var + _EPS) * g + bt

        x = jnp.asarray(x, jnp.float32)
        x = jnp.maximum(ln(mm(x, self.w_in) + self.b_in, self.g_in, self.bt_in),
                        0.0)
        for li, cfg in enumerate(self.layer_cfg):
            outs, off = [], 0
            for (ci, _, _co), p in zip(cfg, self.cells[li]):
                xs = x[:, off:off + ci]
                off += ci
                hc = jnp.maximum(
                    ln(mm(xs, p["w1"]) + p["b1"], p["g1"], p["bt1"]), 0.0)
                outs.append(mm(hc, p["w2"]) + p["b2"])
            x = jnp.concatenate(outs, axis=-1)
            if li < len(self.layer_cfg) - 1:
                w, b, g, bt = self.connect[li]
                x = jnp.maximum(ln(mm(x, w) + b, g, bt), 0.0)
        return jnp.tanh(mm(x, self.w_out) + self.b_out)


if __name__ == "__main__":
    key = jax.random.PRNGKey(0)
    k_params, k_x = jax.random.split(key)

    net = EvolvableMacroNetworkPallas(k_params, num_inputs=16, num_outputs=4,
                                      cell_hidden=32)

    batch = 2
    x = jax.random.normal(k_x, (batch, 16), jnp.float32)

    y = net.forward(x)
    y = jax.block_until_ready(y)
    assert y.shape == (batch, 4), y.shape
    assert bool(jnp.all(jnp.isfinite(y)))

    y_ref = net.reference_forward(x)
    assert bool(jnp.allclose(y, y_ref, atol=2e-4, rtol=2e-4)), (y, y_ref)

    print("KERNEL_OK")
</pallas_src>

<mosaic_0001>
module attributes {stable_mosaic.version = 11 : i64} {
  func.func @_macro_forward_kernel(%arg0: i32, %arg1: memref<8x16xf32, #tpu.memory_space<vmem>>, %arg2: memref<1x1920xf32, #tpu.memory_space<vmem>>, %arg3: memref<16x24xf32, #tpu.memory_space<vmem>>, %arg4: memref<24x24xf32, #tpu.memory_space<vmem>>, %arg5: memref<24x64xf32, #tpu.memory_space<vmem>>, %arg6: memref<64x64xf32, #tpu.memory_space<vmem>>, %arg7: memref<64x20xf32, #tpu.memory_space<vmem>>, %arg8: memref<20x24xf32, #tpu.memory_space<vmem>>, %arg9: memref<24x24xf32, #tpu.memory_space<vmem>>, %arg10: memref<24x64xf32, #tpu.memory_space<vmem>>, %arg11: memref<64x64xf32, #tpu.memory_space<vmem>>, %arg12: memref<64x12xf32, #tpu.memory_space<vmem>>, %arg13: memref<12x4xf32, #tpu.memory_space<vmem>>, %arg14: memref<8x4xf32, #tpu.memory_space<vmem>>) attributes {dimension_semantics = [#tpu.dimension_semantics<parallel>], iteration_bounds = array<i64: 1>, scalar_prefetch = 0 : i64, scratch_operands = 0 : i64, tpu.core_type = #tpu.core_type<tc>, window_params = [{transform_indices = @transform_0, window_bounds = array<i64: 8, 16>}, {pipeline_mode = #tpu.pipeline_mode<synchronous>, transform_indices = @transform_1, window_bounds = array<i64: 1, 1920>}, {pipeline_mode = #tpu.pipeline_mode<synchronous>, transform_indices = @transform_2, window_bounds = array<i64: 16, 24>}, {pipeline_mode = #tpu.pipeline_mode<synchronous>, transform_indices = @transform_3, window_bounds = array<i64: 24, 24>}, {pipeline_mode = #tpu.pipeline_mode<synchronous>, transform_indices = @transform_4, window_bounds = array<i64: 24, 64>}, {pipeline_mode = #tpu.pipeline_mode<synchronous>, transform_indices = @transform_5, window_bounds = array<i64: 64, 64>}, {pipeline_mode = #tpu.pipeline_mode<synchronous>, transform_indices = @transform_6, window_bounds = array<i64: 64, 20>}, {pipeline_mode = #tpu.pipeline_mode<synchronous>, transform_indices = @transform_7, window_bounds = array<i64: 20, 24>}, {pipeline_mode = #tpu.pipeline_mode<synchronous>, transform_indices = @transform_8, window_bounds = array<i64: 24, 24>}, {pipeline_mode = #tpu.pipeline_mode<synchronous>, transform_indices = @transform_9, window_bounds = array<i64: 24, 64>}, {pipeline_mode = #tpu.pipeline_mode<synchronous>, transform_indices = @transform_10, window_bounds = array<i64: 64, 64>}, {pipeline_mode = #tpu.pipeline_mode<synchronous>, transform_indices = @transform_11, window_bounds = array<i64: 64, 12>}, {pipeline_mode = #tpu.pipeline_mode<synchronous>, transform_indices = @transform_12, window_bounds = array<i64: 12, 4>}, {transform_indices = @transform_13, window_bounds = array<i64: 8, 4>}]} {
    %c0 = arith.constant 0 : index
    %c0_0 = arith.constant 0 : index
    %0 = vector.load %arg1[%c0, %c0_0] : memref<8x16xf32, #tpu.memory_space<vmem>>, vector<8x16xf32>
    %c0_1 = arith.constant 0 : index
    %c0_2 = arith.constant 0 : index
    %1 = vector.load %arg3[%c0_1, %c0_2] : memref<16x24xf32, #tpu.memory_space<vmem>>, vector<16x24xf32>
    %cst = arith.constant dense<0.000000e+00> : vector<8x24xf32>
    %2 = tpu.matmul %0, %1, %cst {dimension_numbers = #tpu.dot_dimension_numbers<[1], [0], [0], [1], [0, 0, 1, 1], [], []>, precision = #tpu.contract_precision<fp32>} : vector<8x16xf32>, vector<16x24xf32>, vector<8x24xf32> -> vector<8x24xf32>
    %c0_3 = arith.constant 0 : index
    %c0_4 = arith.constant 0 : index
    %3 = vector.load %arg2[%c0_3, %c0_4] : memref<1x1920xf32, #tpu.memory_space<vmem>>, vector<1x24xf32>
    %4 = vector.broadcast %3 : vector<1x24xf32> to vector<8x24xf32>
    %5 = arith.addf %2, %4 : vector<8x24xf32>
    %c0_5 = arith.constant 0 : index
    %c0_6 = arith.constant 0 : index
    %6 = vector.load %arg4[%c0_5, %c0_6] : memref<24x24xf32, #tpu.memory_space<vmem>>, vector<24x24xf32>
    %c0_7 = arith.constant 0 : index
    %c128 = arith.constant 128 : index
    %7 = vector.load %arg2[%c0_7, %c128] : memref<1x1920xf32, #tpu.memory_space<vmem>>, vector<1x24xf32>
    %c0_8 = arith.constant 0 : index
    %c256 = arith.constant 256 : index
    %8 = vector.load %arg2[%c0_8, %c256] : memref<1x1920xf32, #tpu.memory_space<vmem>>, vector<1x24xf32>
    %cst_9 = arith.constant dense<0.000000e+00> : vector<8x24xf32>
    %9 = tpu.matmul %5, %6, %cst_9 {dimension_numbers = #tpu.dot_dimension_numbers<[1], [0], [0], [1], [0, 0, 1, 1], [], []>, precision = #tpu.contract_precision<fp32>} : vector<8x24xf32>, vector<24x24xf32>, vector<8x24xf32> -> vector<8x24xf32>
    %10 = arith.subf %5, %9 : vector<8x24xf32>
    %11 = arith.mulf %10, %10 : vector<8x24xf32>
    %cst_10 = arith.constant dense<0.000000e+00> : vector<8x24xf32>
    %12 = tpu.matmul %11, %6, %cst_10 {dimension_numbers = #tpu.dot_dimension_numbers<[1], [0], [0], [1], [0, 0, 1, 1], [], []>, precision = #tpu.contract_precision<fp32>} : vector<8x24xf32>, vector<24x24xf32>, vector<8x24xf32> -> vector<8x24xf32>
    %cst_11 = arith.constant 9.99999974E-6 : f32
    %13 = vector.broadcast %cst_11 : f32 to vector<8x24xf32>
    %14 = arith.addf %12, %13 : vector<8x24xf32>
    %15 = math.rsqrt %14 : vector<8x24xf32>
    %16 = arith.mulf %10, %15 : vector<8x24xf32>
    %17 = vector.broadcast %7 : vector<1x24xf32> to vector<8x24xf32>
    %18 = arith.mulf %16, %17 : vector<8x24xf32>
    %19 = vector.broadcast %8 : vector<1x24xf32> to vector<8x24xf32>
    %20 = arith.addf %18, %19 : vector<8x24xf32>
    %cst_12 = arith.constant 0.000000e+00 : f32
    %21 = vector.broadcast %cst_12 : f32 to vector<8x24xf32>
    %22 = arith.maximumf %20, %21 : vector<8x24xf32>
    %c0_13 = arith.constant 0 : index
    %c0_14 = arith.constant 0 : index
    %23 = vector.load %arg5[%c0_13, %c0_14] : memref<24x64xf32, #tpu.memory_space<vmem>>, vector<24x64xf32>
    %cst_15 = arith.constant dense<0.000000e+00> : vector<8x64xf32>
    %24 = tpu.matmul %22, %23, %cst_15 {dimension_numbers = #tpu.dot_dimension_numbers<[1], [0], [0], [1], [0, 0, 1, 1], [], []>, precision = #tpu.contract_precision<fp32>} : vector<8x24xf32>, vector<24x64xf32>, vector<8x64xf32> -> vector<8x64xf32>
    %c0_16 = arith.constant 0 : index
    %c384 = arith.constant 384 : index
    %25 = vector.load %arg2[%c0_16, %c384] : memref<1x1920xf32, #tpu.memory_space<vmem>>, vector<1x64xf32>
    %26 = vector.broadcast %25 : vector<1x64xf32> to vector<8x64xf32>
    %27 = arith.addf %24, %26 : vector<8x64xf32>
    %c0_17 = arith.constant 0 : index
    %c0_18 = arith.constant 0 : index
    %28 = vector.load %arg6[%c0_17, %c0_18] : memref<64x64xf32, #tpu.memory_space<vmem>>, vector<64x64xf32>
    %c0_19 = arith.constant 0 : index
    %c512 = arith.constant 512 : index
    %29 = vector.load %arg2[%c0_19, %c512] : memref<1x1920xf32, #tpu.memory_space<vmem>>, vector<1x64xf32>
    %c0_20 = arith.constant 0 : index
    %c640 = arith.constant 640 : index
    %30 = vector.load %arg2[%c0_20, %c640] : memref<1x1920xf32, #tpu.memory_space<vmem>>, vector<1x64xf32>
    %cst_21 = arith.constant dense<0.000000e+00> : vector<8x64xf32>
    %31 = tpu.matmul %27, %28, %cst_21 {dimension_numbers = #tpu.dot_dimension_numbers<[1], [0], [0], [1], [0, 0, 1, 1], [], []>, precision = #tpu.contract_precision<fp32>} : vector<8x64xf32>, vector<64x64xf32>, vector<8x64xf32> -> vector<8x64xf32>
    %32 = arith.subf %27, %31 : vector<8x64xf32>
    %33 = arith.mulf %32, %32 : vector<8x64xf32>
    %cst_22 = arith.constant dense<0.000000e+00> : vector<8x64xf32>
    %34 = tpu.matmul %33, %28, %cst_22 {dimension_numbers = #tpu.dot_dimension_numbers<[1], [0], [0], [1], [0, 0, 1, 1], [], []>, precision = #tpu.contract_precision<fp32>} : vector<8x64xf32>, vector<64x64xf32>, vector<8x64xf32> -> vector<8x64xf32>
    %cst_23 = arith.constant 9.99999974E-6 : f32
    %35 = vector.broadcast %cst_23 : f32 to vector<8x64xf32>
    %36 = arith.addf %34, %35 : vector<8x64xf32>
    %37 = math.rsqrt %36 : vector<8x64xf32>
    %38 = arith.mulf %32, %37 : vector<8x64xf32>
    %39 = vector.broadcast %29 : vector<1x64xf32> to vector<8x64xf32>
    %40 = arith.mulf %38, %39 : vector<8x64xf32>
    %41 = vector.broadcast %30 : vector<1x64xf32> to vector<8x64xf32>
    %42 = arith.addf %40, %41 : vector<8x64xf32>
    %cst_24 = arith.constant 0.000000e+00 : f32
    %43 = vector.broadcast %cst_24 : f32 to vector<8x64xf32>
    %44 = arith.maximumf %42, %43 : vector<8x64xf32>
    %c0_25 = arith.constant 0 : index
    %c0_26 = arith.constant 0 : index
    %45 = vector.load %arg7[%c0_25, %c0_26] : memref<64x20xf32, #tpu.memory_space<vmem>>, vector<64x20xf32>
    %cst_27 = arith.constant dense<0.000000e+00> : vector<8x20xf32>
    %46 = tpu.matmul %44, %45, %cst_27 {dimension_numbers = #tpu.dot_dimension_numbers<[1], [0], [0], [1], [0, 0, 1, 1], [], []>, precision = #tpu.contract_precision<fp32>} : vector<8x64xf32>, vector<64x20xf32>, vector<8x20xf32> -> vector<8x20xf32>
    %c0_28 = arith.constant 0 : index
    %c768 = arith.constant 768 : index
    %47 = vector.load %arg2[%c0_28, %c768] : memref<1x1920xf32, #tpu.memory_space<vmem>>, vector<1x20xf32>
    %48 = vector.broadcast %47 : vector<1x20xf32> to vector<8x20xf32>
    %49 = arith.addf %46, %48 : vector<8x20xf32>
    %c0_29 = arith.constant 0 : index
    %c0_30 = arith.constant 0 : index
    %50 = vector.load %arg8[%c0_29, %c0_30] : memref<20x24xf32, #tpu.memory_space<vmem>>, vector<20x24xf32>
    %cst_31 = arith.constant dense<0.000000e+00> : vector<8x24xf32>
    %51 = tpu.matmul %49, %50, %cst_31 {dimension_numbers = #tpu.dot_dimension_numbers<[1], [0], [0], [1], [0, 0, 1, 1], [], []>, precision = #tpu.contract_precision<fp32>} : vector<8x20xf32>, vector<20x24xf32>, vector<8x24xf32> -> vector<8x24xf32>
    %c0_32 = arith.constant 0 : index
    %c896 = arith.constant 896 : index
    %52 = vector.load %arg2[%c0_32, %c896] : memref<1x1920xf32, #tpu.memory_space<vmem>>, vector<1x24xf32>
    %53 = vector.broadcast %52 : vector<1x24xf32> to vector<8x24xf32>
    %54 = arith.addf %51, %53 : vector<8x24xf32>
    %c0_33 = arith.constant 0 : index
    %c0_34 = arith.constant 0 : index
    %55 = vector.load %arg9[%c0_33, %c0_34] : memref<24x24xf32, #tpu.memory_space<vmem>>, vector<24x24xf32>
    %c0_35 = arith.constant 0 : index
    %c1024 = arith.constant 1024 : index
    %56 = vector.load %arg2[%c0_35, %c1024] : memref<1x1920xf32, #tpu.memory_space<vmem>>, vector<1x24xf32>
    %c0_36 = arith.constant 0 : index
    %c1152 = arith.constant 1152 : index
    %57 = vector.load %arg2[%c0_36, %c1152] : memref<1x1920xf32, #tpu.memory_space<vmem>>, vector<1x24xf32>
    %cst_37 = arith.constant dense<0.000000e+00> : vector<8x24xf32>
    %58 = tpu.matmul %54, %55, %cst_37 {dimension_numbers = #tpu.dot_dimension_numbers<[1], [0], [0], [1], [0, 0, 1, 1], [], []>, precision = #tpu.contract_precision<fp32>} : vector<8x24xf32>, vector<24x24xf32>, vector<8x24xf32> -> vector<8x24xf32>
    %59 = arith.subf %54, %58 : vector<8x24xf32>
    %60 = arith.mulf %59, %59 : vector<8x24xf32>
    %cst_38 = arith.constant dense<0.000000e+00> : vector<8x24xf32>
    %61 = tpu.matmul %60, %55, %cst_38 {dimension_numbers = #tpu.dot_dimension_numbers<[1], [0], [0], [1], [0, 0, 1, 1], [], []>, precision = #tpu.contract_precision<fp32>} : vector<8x24xf32>, vector<24x24xf32>, vector<8x24xf32> -> vector<8x24xf32>
    %cst_39 = arith.constant 9.99999974E-6 : f32
    %62 = vector.broadcast %cst_39 : f32 to vector<8x24xf32>
    %63 = arith.addf %61, %62 : vector<8x24xf32>
    %64 = math.rsqrt %63 : vector<8x24xf32>
    %65 = arith.mulf %59, %64 : vector<8x24xf32>
    %66 = vector.broadcast %56 : vector<1x24xf32> to vector<8x24xf32>
    %67 = arith.mulf %65, %66 : vector<8x24xf32>
    %68 = vector.broadcast %57 : vector<1x24xf32> to vector<8x24xf32>
    %69 = arith.addf %67, %68 : vector<8x24xf32>
    %cst_40 = arith.constant 0.000000e+00 : f32
    %70 = vector.broadcast %cst_40 : f32 to vector<8x24xf32>
    %71 = arith.maximumf %69, %70 : vector<8x24xf32>
    %c0_41 = arith.constant 0 : index
    %c0_42 = arith.constant 0 : index
    %72 = vector.load %arg10[%c0_41, %c0_42] : memref<24x64xf32, #tpu.memory_space<vmem>>, vector<24x64xf32>
    %cst_43 = arith.constant dense<0.000000e+00> : vector<8x64xf32>
    %73 = tpu.matmul %71, %72, %cst_43 {dimension_numbers = #tpu.dot_dimension_numbers<[1], [0], [0], [1], [0, 0, 1, 1], [], []>, precision = #tpu.contract_precision<fp32>} : vector<8x24xf32>, vector<24x64xf32>, vector<8x64xf32> -> vector<8x64xf32>
    %c0_44 = arith.constant 0 : index
    %c1280 = arith.constant 1280 : index
    %74 = vector.load %arg2[%c0_44, %c1280] : memref<1x1920xf32, #tpu.memory_space<vmem>>, vector<1x64xf32>
    %75 = vector.broadcast %74 : vector<1x64xf32> to vector<8x64xf32>
    %76 = arith.addf %73, %75 : vector<8x64xf32>
    %c0_45 = arith.constant 0 : index
    %c0_46 = arith.constant 0 : index
    %77 = vector.load %arg11[%c0_45, %c0_46] : memref<64x64xf32, #tpu.memory_space<vmem>>, vector<64x64xf32>
    %c0_47 = arith.constant 0 : index
    %c1408 = arith.constant 1408 : index
    %78 = vector.load %arg2[%c0_47, %c1408] : memref<1x1920xf32, #tpu.memory_space<vmem>>, vector<1x64xf32>
    %c0_48 = arith.constant 0 : index
    %c1536 = arith.constant 1536 : index
    %79 = vector.load %arg2[%c0_48, %c1536] : memref<1x1920xf32, #tpu.memory_space<vmem>>, vector<1x64xf32>
    %cst_49 = arith.constant dense<0.000000e+00> : vector<8x64xf32>
    %80 = tpu.matmul %76, %77, %cst_49 {dimension_numbers = #tpu.dot_dimension_numbers<[1], [0], [0], [1], [0, 0, 1, 1], [], []>, precision = #tpu.contract_precision<fp32>} : vector<8x64xf32>, vector<64x64xf32>, vector<8x64xf32> -> vector<8x64xf32>
    %81 = arith.subf %76, %80 : vector<8x64xf32>
    %82 = arith.mulf %81, %81 : vector<8x64xf32>
    %cst_50 = arith.constant dense<0.000000e+00> : vector<8x64xf32>
    %83 = tpu.matmul %82, %77, %cst_50 {dimension_numbers = #tpu.dot_dimension_numbers<[1], [0], [0], [1], [0, 0, 1, 1], [], []>, precision = #tpu.contract_precision<fp32>} : vector<8x64xf32>, vector<64x64xf32>, vector<8x64xf32> -> vector<8x64xf32>
    %cst_51 = arith.constant 9.99999974E-6 : f32
    %84 = vector.broadcast %cst_51 : f32 to vector<8x64xf32>
    %85 = arith.addf %83, %84 : vector<8x64xf32>
    %86 = math.rsqrt %85 : vector<8x64xf32>
    %87 = arith.mulf %81, %86 : vector<8x64xf32>
    %88 = vector.broadcast %78 : vector<1x64xf32> to vector<8x64xf32>
    %89 = arith.mulf %87, %88 : vector<8x64xf32>
    %90 = vector.broadcast %79 : vector<1x64xf32> to vector<8x64xf32>
    %91 = arith.addf %89, %90 : vector<8x64xf32>
    %cst_52 = arith.constant 0.000000e+00 : f32
    %92 = vector.broadcast %cst_52 : f32 to vector<8x64xf32>
    %93 = arith.maximumf %91, %92 : vector<8x64xf32>
    %c0_53 = arith.constant 0 : index
    %c0_54 = arith.constant 0 : index
    %94 = vector.load %arg12[%c0_53, %c0_54] : memref<64x12xf32, #tpu.memory_space<vmem>>, vector<64x12xf32>
    %cst_55 = arith.constant dense<0.000000e+00> : vector<8x12xf32>
    %95 = tpu.matmul %93, %94, %cst_55 {dimension_numbers = #tpu.dot_dimension_numbers<[1], [0], [0], [1], [0, 0, 1, 1], [], []>, precision = #tpu.contract_precision<fp32>} : vector<8x64xf32>, vector<64x12xf32>, vector<8x12xf32> -> vector<8x12xf32>
    %c0_56 = arith.constant 0 : index
    %c1664 = arith.constant 1664 : index
    %96 = vector.load %arg2[%c0_56, %c1664] : memref<1x1920xf32, #tpu.memory_space<vmem>>, vector<1x12xf32>
    %97 = vector.broadcast %96 : vector<1x12xf32> to vector<8x12xf32>
    %98 = arith.addf %95, %97 : vector<8x12xf32>
    %c0_57 = arith.constant 0 : index
    %c0_58 = arith.constant 0 : index
    %99 = vector.load %arg13[%c0_57, %c0_58] : memref<12x4xf32, #tpu.memory_space<vmem>>, vector<12x4xf32>
    %cst_59 = arith.constant dense<0.000000e+00> : vector<8x4xf32>
    %100 = tpu.matmul %98, %99, %cst_59 {dimension_numbers = #tpu.dot_dimension_numbers<[1], [0], [0], [1], [0, 0, 1, 1], [], []>, precision = #tpu.contract_precision<fp32>} : vector<8x12xf32>, vector<12x4xf32>, vector<8x4xf32> -> vector<8x4xf32>
    %c0_60 = arith.constant 0 : index
    %c1792 = arith.constant 1792 : index
    %101 = vector.load %arg2[%c0_60, %c1792] : memref<1x1920xf32, #tpu.memory_space<vmem>>, vector<1x4xf32>
    %102 = vector.broadcast %101 : vector<1x4xf32> to vector<8x4xf32>
    %103 = arith.addf %100, %102 : vector<8x4xf32>
    %104 = math.tanh %103 : vector<8x4xf32>
    %c0_61 = arith.constant 0 : index
    %c0_62 = arith.constant 0 : index
    %105 = vector.load %arg14[%c0_61, %c0_62] : memref<8x4xf32, #tpu.memory_space<vmem>>, vector<8x4xf32>
    tpu.vector_store %arg14[%c0_61, %c0_62], %104 {strides = array<i32>} : memref<8x4xf32, #tpu.memory_space<vmem>>, vector<8x4xf32>,
    return
  }
  func.func @transform_0(%arg0: i32) -> (i32, i32) {
    %c0_i32 = arith.constant 0 : i32
    %c0_i32_0 = arith.constant 0 : i32
    return %arg0, %c0_i32 : i32, i32
  }
  func.func @transform_1(%arg0: i32) -> (i32, i32) {
    %c0_i32 = arith.constant 0 : i32
    %c0_i32_0 = arith.constant 0 : i32
    %c0_i32_1 = arith.constant 0 : i32
    return %c0_i32, %c0_i32_0 : i32, i32
  }
  func.func @transform_2(%arg0: i32) -> (i32, i32) {
    %c0_i32 = arith.constant 0 : i32
    %c0_i32_0 = arith.constant 0 : i32
    %c0_i32_1 = arith.constant 0 : i32
    return %c0_i32, %c0_i32_0 : i32, i32
  }
  func.func @transform_3(%arg0: i32) -> (i32, i32) {
    %c0_i32 = arith.constant 0 : i32
    %c0_i32_0 = arith.constant 0 : i32
    %c0_i32_1 = arith.constant 0 : i32
    return %c0_i32, %c0_i32_0 : i32, i32
  }
  func.func @transform_4(%arg0: i32) -> (i32, i32) {
    %c0_i32 = arith.constant 0 : i32
    %c0_i32_0 = arith.constant 0 : i32
    %c0_i32_1 = arith.constant 0 : i32
    return %c0_i32, %c0_i32_0 : i32, i32
  }
  func.func @transform_5(%arg0: i32) -> (i32, i32) {
    %c0_i32 = arith.constant 0 : i32
    %c0_i32_0 = arith.constant 0 : i32
    %c0_i32_1 = arith.constant 0 : i32
    return %c0_i32, %c0_i32_0 : i32, i32
  }
  func.func @transform_6(%arg0: i32) -> (i32, i32) {
    %c0_i32 = arith.constant 0 : i32
    %c0_i32_0 = arith.constant 0 : i32
    %c0_i32_1 = arith.constant 0 : i32
    return %c0_i32, %c0_i32_0 : i32, i32
  }
  func.func @transform_7(%arg0: i32) -> (i32, i32) {
    %c0_i32 = arith.constant 0 : i32
    %c0_i32_0 = arith.constant 0 : i32
    %c0_i32_1 = arith.constant 0 : i32
    return %c0_i32, %c0_i32_0 : i32, i32
  }
  func.func @transform_8(%arg0: i32) -> (i32, i32) {
    %c0_i32 = arith.constant 0 : i32
    %c0_i32_0 = arith.constant 0 : i32
    %c0_i32_1 = arith.constant 0 : i32
    return %c0_i32, %c0_i32_0 : i32, i32
  }
  func.func @transform_9(%arg0: i32) -> (i32, i32) {
    %c0_i32 = arith.constant 0 : i32
    %c0_i32_0 = arith.constant 0 : i32
    %c0_i32_1 = arith.constant 0 : i32
    return %c0_i32, %c0_i32_0 : i32, i32
  }
  func.func @transform_10(%arg0: i32) -> (i32, i32) {
    %c0_i32 = arith.constant 0 : i32
    %c0_i32_0 = arith.constant 0 : i32
    %c0_i32_1 = arith.constant 0 : i32
    return %c0_i32, %c0_i32_0 : i32, i32
  }
  func.func @transform_11(%arg0: i32) -> (i32, i32) {
    %c0_i32 = arith.constant 0 : i32
    %c0_i32_0 = arith.constant 0 : i32
    %c0_i32_1 = arith.constant 0 : i32
    return %c0_i32, %c0_i32_0 : i32, i32
  }
  func.func @transform_12(%arg0: i32) -> (i32, i32) {
    %c0_i32 = arith.constant 0 : i32
    %c0_i32_0 = arith.constant 0 : i32
    %c0_i32_1 = arith.constant 0 : i32
    return %c0_i32, %c0_i32_0 : i32, i32
  }
  func.func @transform_13(%arg0: i32) -> (i32, i32) {
    %c0_i32 = arith.constant 0 : i32
    %c0_i32_0 = arith.constant 0 : i32
    return %arg0, %c0_i32 : i32, i32
  }
}

</mosaic_0001>

<bundles_post_ra>
// kernel: tpu_custom_call.1
= control target key start
LH: loop header
LB: loop body
LE: loop exit
PB: predicated region body
PF: predicated region fallthrough
CT: control target
= control target key end

     0   :  { %18 = vsyncpa [#allocation3], 0  ;;  %s11514_s0 = inlined_call_operand.hbm [shape: f32[8,16], index: 0, kind: input, shape index: {}]   ;;  %s11515_s1 = inlined_call_operand.hbm [shape: f32[1,1920], index: 1, kind: input, shape index: {}]   ;;  %s11516_s2 = inlined_call_operand.hbm [shape: f32[16,24], index: 2, kind: input, shape index: {}]   ;;  %s11517_s3 = inlined_call_operand.vmem [shape: f32[24,24], index: 3, kind: input, shape index: {}]   ;;  %s11518_s4 = inlined_call_operand.vmem [shape: f32[24,64], index: 4, kind: input, shape index: {}]   ;;  %s11519_s5 = inlined_call_operand.vmem [shape: f32[64,64], index: 5, kind: input, shape index: {}]   ;;  %s11520_s6 = inlined_call_operand.vmem [shape: f32[64,20], index: 6, kind: input, shape index: {}]   ;;  %s11521_s7 = inlined_call_operand.vmem [shape: f32[20,24], index: 7, kind: input, shape index: {}]   ;;  %s11522_s8 = inlined_call_operand.hbm [shape: f32[24,24], index: 8, kind: input, shape index: {}]   ;;  %s11523_s9 = inlined_call_operand.hbm [shape: f32[24,64], index: 9, kind: input, shape index: {}]   ;;  %s11524_s10 = inlined_call_operand.vmem [shape: f32[64,64], index: 10, kind: input, shape index: {}]   ;;  %s11525_s11 = inlined_call_operand.vmem [shape: f32[64,12], index: 11, kind: input, shape index: {}]   ;;  %s11526_s12 = inlined_call_operand.vmem [shape: f32[12,4], index: 12, kind: input, shape index: {}]   ;;  %s11527_s13 = inlined_call_operand.vmem [shape: f32[8,4], index: 13, kind: output, shape index: {}]  }
   0x1   :  { %19 = vsyncpa [#allocation5], 0 }
   0x2   :  { %20 = vsyncpa [#allocation8], 0  ;;  %s10383_s25 = smov [#allocation4]   ;;  %s10267_s29 = scalar_lea.hbm %s11515_s1, 240 }
   0x3   :  { %s37_s26 = sshll.u32 %s10383_s25, 4  ;;  %p10268_p0 = scmp.ne.s32.totalorder %s11515_s1, %s10267_s29  ;;  %s38_s26 = int_to_ptr.vmem [resolvable:$true] %s37_s26 }
   0x4   :  { %p10271_p1 = scmp.lt.u32.totalorder %s10267_s29, %s11515_s1 }
   0x6   :  { %p10273_p2 = pnand %p10271_p1, %p10268_p0 }
   0x8   :  { %10276 = shalt.err (!%p10273_p2)
}
   0x9   :  { %s10277_s17 = scalar_lea.vmem %s38_s26, 240  ;;  %s10281_s18 = scalar_lea.vmem %s38_s26, 256 }
   0xa   :  { %p10278_p3 = scmp.ne.s32.totalorder %s38_s26, %s10277_s17  ;;  %p10282_p4 = scmp.lt.s32.totalorder %s38_s26, %s38_s26 }
   0xb   :  { %p10283_p5 = scmp.lt.s32.totalorder %s10281_s18, %s10277_s17 }
   0xd   :  { %p10284_p6 = por %p10283_p5, %p10282_p4 }
   0xf   :  { %p10285_p7 = pnand %p10284_p6, %p10278_p3 }
  0x11   :  { %10288 = shalt.err (!%p10285_p7)
}
  0x12   :  { %40 = dma.hbm_to_vmem [thread:$0]  %s11515_s1, 240, %s38_s26, [#allocation5]  }
  0x13   :  { %s10384_s21 = smov [#allocation7]   ;;  %s10385_s23 = smov [#allocation2]  }
  0x14   :  { %s68_s22 = sshll.u32 %s10384_s21, 4  ;;  %s27_s24 = sshll.u32 %s10385_s23, 4  ;;  %s69_s22 = int_to_ptr.vmem [resolvable:$true] %s68_s22  ;;  %s28_s24 = int_to_ptr.vmem [resolvable:$true] %s27_s24 }
  0x15   :  { %s10289_s28 = scalar_lea.hbm %s11522_s8, 384 }
  0x16   :  { %p10290_p8 = scmp.ne.s32.totalorder %s11522_s8, %s10289_s28  ;;  %p10293_p9 = scmp.lt.u32.totalorder %s10289_s28, %s11522_s8 }
  0x18   :  { %p10295_p10 = pnand %p10293_p9, %p10290_p8 }
  0x1a   :  { %10298 = shalt.err (!%p10295_p10)
}
  0x1b   :  { %s10299_s1 = scalar_lea.vmem %s69_s22, 384  ;;  %p10304_p12 = scmp.lt.s32.totalorder %s69_s22, %s69_s22 }
  0x1c   :  { %p10300_p11 = scmp.ne.s32.totalorder %s69_s22, %s10299_s1  ;;  %p10305_p13 = scmp.lt.s32.totalorder %s10299_s1, %s10299_s1 }
  0x1e   :  { %p10306_p0 = por %p10305_p13, %p10304_p12 }
  0x20   :  { %p10307_p1 = pnand %p10306_p0, %p10300_p11 }
  0x22   :  { %10310 = shalt.err (!%p10307_p1)
}
  0x23   :  { %s10386_s26 = smov 128   ;;  %s10387_s16 = smov 8  }
  0x24   :  { %74 = dma.hbm_to_vmem [thread:$0]  %s11522_s8, 384, %s69_s22, [#allocation8], %s10386_s26, %s10386_s26, %s10387_s16  }
  0x25   :  { %s10311_s21 = scalar_lea.hbm %s11514_s0, 128 }
  0x26   :  { %p10312_p2 = scmp.ne.s32.totalorder %s11514_s0, %s10311_s21  ;;  %p10315_p3 = scmp.lt.u32.totalorder %s10311_s21, %s11514_s0 }
  0x28   :  { %p10317_p4 = pnand %p10315_p3, %p10312_p2 }
  0x2a   :  { %10320 = shalt.err (!%p10317_p4)
}
  0x2b   :  { %s10321_s29 = scalar_lea.vmem %s28_s24, 128  ;;  %p10326_p6 = scmp.lt.s32.totalorder %s28_s24, %s28_s24 }
  0x2c   :  { %p10322_p5 = scmp.ne.s32.totalorder %s28_s24, %s10321_s29  ;;  %p10327_p7 = scmp.lt.s32.totalorder %s10321_s29, %s10321_s29 }
  0x2e   :  { %p10328_p8 = por %p10327_p7, %p10326_p6 }
  0x30   :  { %p10329_p9 = pnand %p10328_p8, %p10322_p5 }
  0x32   :  { %10332 = shalt.err (!%p10329_p9)
}
  0x33   :  { %30 = dma.hbm_to_vmem [thread:$0]  %s11514_s0, 128, %s28_s24, [#allocation3]  }
  0x34   :  { %s10388_s30 = smov [#allocation6]   ;;  %s10389_s15 = smov [#allocation9]  }
  0x35   :  { %s46_s14 = sshll.u32 %s10388_s30, 4  ;;  %s80_s1 = sshll.u32 %s10389_s15, 4  ;;  %s47_s14 = int_to_ptr.vmem [resolvable:$true] %s46_s14  ;;  %s81_s1 = int_to_ptr.vmem [resolvable:$true] %s80_s1 }
  0x36   :  { %s10333_s19 = scalar_lea.hbm %s11516_s2, 256 }
  0x37   :  { %p10334_p10 = scmp.ne.s32.totalorder %s11516_s2, %s10333_s19  ;;  %p10337_p11 = scmp.lt.u32.totalorder %s10333_s19, %s11516_s2 }
  0x39   :  { %p10339_p12 = pnand %p10337_p11, %p10334_p10 }
  0x3b   :  { %10342 = shalt.err (!%p10339_p12)
}
  0x3c   :  { %s10343_s0 = scalar_lea.vmem %s47_s14, 256  ;;  %p10348_p0 = scmp.lt.s32.totalorder %s47_s14, %s47_s14 }
  0x3d   :  { %p10344_p13 = scmp.ne.s32.totalorder %s47_s14, %s10343_s0  ;;  %p10349_p1 = scmp.lt.s32.totalorder %s10343_s0, %s10343_s0 }
  0x3f   :  { %p10350_p2 = por %p10349_p1, %p10348_p0 }
  0x41   :  { %p10351_p3 = pnand %p10350_p2, %p10344_p13 }
  0x43   :  { %10354 = shalt.err (!%p10351_p3)
}
  0x44   :  { %52 = dma.hbm_to_vmem [thread:$0]  %s11516_s2, 256, %s47_s14, [#allocation5], %s10386_s26, %s10386_s26, %s10387_s16  }
  0x45   :  { %s10355_s8 = scalar_lea.hbm %s11523_s9, 384 }
  0x46   :  { %p10356_p4 = scmp.ne.s32.totalorder %s11523_s9, %s10355_s8  ;;  %p10359_p5 = scmp.lt.u32.totalorder %s10355_s8, %s11523_s9 }
  0x48   :  { %p10361_p6 = pnand %p10359_p5, %p10356_p4 }
  0x4a   :  { %10364 = shalt.err (!%p10361_p6)
}
  0x4b   :  { %s10365_s18 = scalar_lea.vmem %s81_s1, 384  ;;  %p10370_p8 = scmp.lt.s32.totalorder %s81_s1, %s81_s1 }
  0x4c   :  { %p10366_p7 = scmp.ne.s32.totalorder %s81_s1, %s10365_s18  ;;  %p10371_p9 = scmp.lt.s32.totalorder %s10365_s18, %s10365_s18 }
  0x4e   :  { %p10372_p10 = por %p10371_p9, %p10370_p8 }
  0x50   :  { %p10373_p11 = pnand %p10372_p10, %p10366_p7 }
  0x52   :  { %10376 = shalt.err (!%p10373_p11)
}
  0x53   :  { %86 = dma.hbm_to_vmem [thread:$0]  %s11523_s9, 384, %s81_s1, [#allocation8], %s10386_s26, %s10386_s26, %s10387_s16  }
  0x54   :  { %10377 = dma.done.wait [#allocation3], 128  }
  0x55   :  { %10378 = vsyncadd [#allocation3], 4294967168 }
  0x56   :  { %10379 = dma.done.wait [#allocation5], 496  }
  0x57   :  { %10380 = vsyncadd [#allocation5], 4294966800 }
  0x58   :  { %10381 = dma.done.wait [#allocation8], 768  }
  0x59   :  { %10382 = vsyncadd [#allocation8], 4294966528  ;;  %v10390_v0 = vmov 0.0|0.0   ;;  %vm10391_vm0 = vmmov 0   ;;  %v10392_v1 = vmov 0.0   ;;  %vm118_vm1 = vcmask 130048  }
  0x5a   :  { %9493 = vmatprep.subr.bf16.mxu0 %v10390_v0  ;;  %8351 = vmatprep.mubr.msk.f32.mxu0 %vm10391_vm0, %v10392_v1  ;;  %v109_v2 = vld [vmem:[#allocation6] sm:$0xff]  ;;  %v110_v3 = vld [vmem:[#allocation6 + $0x8] sm:$0xff]  ;;  %v582_v26 = vld [vmem:[%s11517_s3 + $0x8] sm:$0xff]  ;;  %vm586_vm2 = vcmask 195584   ;;  %vm2051_vm3 = vcmask 523264   ;;  %vm3720_vm4 = vcmask 1043456  }
  0x5b   :  { %9511 = vmatprep.subr.bf16.mxu1 %v10390_v0  ;;  %8395 = vmatprep.mubr.msk.f32.mxu1 %vm10391_vm0, %v10392_v1  ;;  %v108_v4 = vld [vmem:[#allocation2] sm:$0xff]  ;;  %v123_v5 = vand.u32 4294901760, %v109_v2  ;;  %v126_v6 = vand.u32 4294901760, %v110_v3  ;;  %v594_v28 = vand.u32 4294901760, %v582_v26  ;;  %v583_v29 = vld [vmem:[%s11517_s3 + $0x10] sm:$0xff]  ;;  %vm3716_vm5 = vcmask 162816  }
  0x5c   :  { %v120_v7 = vsel %vm118_vm1, %v108_v4, 0  ;;  %v581_v25 = vld [vmem:[%s11517_s3] sm:$0xff]  ;;  %v10568_v33 = vand.u32 4294901760, %v583_v29  ;;  %v7804_v43 = vld [vmem:[#allocation4] ss:$0 sm:$0xff]  ;;  %vm7328_vm6 = vcmask 97280  }
  0x5d   :  { %v189_v8 = vand.u32 4294901760, %v120_v7  ;;  %v9494_v9 = vpack.c.bf16 %v126_v6, %v123_v5  ;;  %v201_v10 = vsub.f32 %v109_v2, %v123_v5  ;;  %v208_v11 = vsub.f32 %v110_v3, %v126_v6  ;;  %v1556_v5 = vld [vmem:[%s11518_s4] sm:$0xff]  ;;  %v1557_v6 = vld [vmem:[%s11518_s4 + $0x8] sm:$0xff] }
  0x5e   :  { %v591_v27 = vand.u32 4294901760, %v581_v25  ;;  %v677_v32 = vsub.f32 %v582_v26, %v594_v28  ;;  %v684_v48 = vsub.f32 %v583_v29, %v10568_v33  ;;  %vm7795_vm7 = vcmask 31744  }
  0x5f   :  { %v190_v12 = vsub.f32 %v120_v7, %v189_v8  ;;  %9495 = vmatpush3.bf16.msra.mxu0 %v9494_v9  ;;  %v202_v13 = vand.u32 4294901760, %v201_v10  ;;  %v209_v14 = vand.u32 4294901760, %v208_v11  ;;  %v9500_v23 = vpack.c.bf16 %v208_v11, %v201_v10 }
  0x60   :  { %9496 = vmatprep.subr.bf16.mxu0 %v10390_v0  ;;  %v10565_v30 = vpack.c.bf16 %v594_v28, %v591_v27  ;;  %v670_v31 = vsub.f32 %v581_v25, %v591_v27  ;;  %v678_v35 = vand.u32 4294901760, %v677_v32  ;;  %v10583_v51 = vand.u32 4294901760, %v684_v48 }
  0x61   :  { %v191_v15 = vand.u32 4294901760, %v190_v12  ;;  %v203_v16 = vsub.f32 %v201_v10, %v202_v13  ;;  %v210_v17 = vsub.f32 %v208_v11, %v209_v14  ;;  %v9506_v24 = vpack.c.bf16 %v209_v14, %v202_v13 }
  0x62   :  { %9513 = vmatpush3.bf16.msra.mxu1 %v10565_v30  ;;  %v671_v34 = vand.u32 4294901760, %v670_v31  ;;  %v679_v37 = vsub.f32 %v677_v32, %v678_v35  ;;  %v10577_v41 = vpack.c.bf16 %v677_v32, %v670_v31  ;;  %v686_v54 = vsub.f32 %v684_v48, %v10583_v51  ;;  %v7805_v32 = vld [vmem:[#allocation4 + $0x1] ss:$0 sm:$0xff] }
  0x63   :  { %v192_v18 = vsub.f32 %v190_v12, %v191_v15  ;;  %v204_v19 = vand.u32 4294901760, %v203_v16  ;;  %v211_v20 = vand.u32 4294901760, %v210_v17  ;;  %8393 = vmatprep.subr.mxu1 %v10392_v1  ;;  %v1570_v7 = vand.u32 4294901760, %v1556_v5 }
  0x64   :  { %v672_v36 = vsub.f32 %v670_v31, %v671_v34  ;;  %v680_v39 = vand.u32 4294901760, %v679_v37  ;;  %v10579_v42 = vpack.c.bf16 %v678_v35, %v671_v34  ;;  %v687_v56 = vand.u32 4294901760, %v686_v54  ;;  %v7806_v34 = vld [vmem:[#allocation4 + $0x2] ss:$0 sm:$0xff] }
  0x65   :  { %v193_v21 = vand.u32 4294901760, %v192_v18  ;;  %v9497_v22 = vpack.c.bf16 %v211_v20, %v204_v19  ;;  %v1649_v11 = vsub.f32 %v1556_v5, %v1570_v7  ;;  %v2046_v54 = vld [vmem:[%s11519_s5 + $0x28] sm:$0xff] }
  0x66   :  { %8394 = vmatpush3.msra.mxu1 %v10568_v33  ;;  %v673_v38 = vand.u32 4294901760, %v672_v36 }
  0x67   :  { %8352 = vmatmul.mubr.f32.vlgmr.msra.gmra.mrb[0].mxu0 %v193_v21  ;;  %9514 = vmatprep.subr.bf16.mxu1 %v10390_v0  ;;  %v1650_v14 = vand.u32 4294901760, %v1649_v11 }
  0x68   :  { %9498 = vmatpush3.bf16.msra.mxu0 %v9497_v22  ;;  %8358 = vmatprep.mubr.msk.f32.mxu0 %vm10391_vm0, %v10392_v1  ;;  %v9515_v40 = vpack.c.bf16 %v680_v39, %v673_v38 }
  0x69   :  { %9499 = vmatprep.subr.bf16.mxu0 %v10390_v0  ;;  %v1651_v16 = vsub.f32 %v1649_v11, %v1650_v14 }
  0x6b   :  { %v1652_v18 = vand.u32 4294901760, %v1651_v16 }
  0x6f   :  { %8359 = vmatmul.mubr.f32.vlgmr.msra.gmra.mrb[0].mxu0 %v189_v8 }
  0x70   :  { %9501 = vmatpush3.bf16.msra.mxu0 %v9500_v23  ;;  %8365 = vmatprep.mubr.msk.f32.mxu0 %vm10391_vm0, %v10392_v1  ;;  %v10669_v23 = vld [vmem:[%s11519_s5] sm:$0xff] }
  0x71   :  { %9502 = vmatprep.subr.bf16.mxu0 %v10390_v0  ;;  %v2056_v25 = vand.u32 4294901760, %v10669_v23 }
  0x77   :  { %8366 = vmatmul.mubr.f32.vlgmr.msra.gmra.mrb[0].mxu0 %v190_v12 }
  0x78   :  { %9504 = vmatpush3.bf16.msra.mxu0 %v9494_v9  ;;  %8372 = vmatprep.mubr.msk.f32.mxu0 %vm10391_vm0, %v10392_v1 }
  0x79   :  { %9505 = vmatprep.subr.bf16.mxu0 %v10390_v0 }
  0x7f   :  { %8373 = vmatmul.mubr.f32.vlgmr.msra.gmra.mrb[0].mxu0 %v191_v15 }
  0x80   :  { %9507 = vmatpush3.bf16.msra.mxu0 %v9506_v24  ;;  %8379 = vmatprep.mubr.msk.f32.mxu0 %vm10391_vm0, %v10392_v1  ;;  %v10674_v24 = vld [vmem:[%s11519_s5 + $0x8] sm:$0xff] }
  0x81   :  { %9508 = vmatprep.subr.bf16.mxu0 %v10390_v0  ;;  %v2059_v26 = vand.u32 4294901760, %v10674_v24 }
  0x83   :  { %v10682_v27 = vpack.c.bf16 %v2059_v26, %v2056_v25 }
  0x87   :  { %8380 = vmatmul.mubr.f32.vlgmr.msra.gmra.mrb[0].mxu0 %v189_v8 }
  0x88   :  { %9510 = vmatpush3.bf16.msra.mxu0 %v9494_v9  ;;  %8386 = vmatprep.mubr.msk.f32.mxu0 %vm10391_vm0, %v10392_v1  ;;  %v1558_v9 = vld [vmem:[%s11518_s4 + $0x10] sm:$0xff] }
  0x89   :  { %9529 = vmatprep.subr.bf16.mxu0 %v10390_v0  ;;  %v10661_v13 = vand.u32 4294901760, %v1558_v9 }
  0x8b   :  { %v1663_v38 = vsub.f32 %v1558_v9, %v10661_v13 }
  0x8f   :  { %8387 = vmatmul.mubr.f32.vlgmr.msra.gmra.mrb[0].mxu0 %v189_v8  ;;  %v1573_v8 = vand.u32 4294901760, %v1557_v6 }
  0x90   :  { %8449 = vmatprep.mubr.msk.f32.mxu0 %vm10391_vm0, %v10392_v1  ;;  %9531 = vmatpush3.bf16.msra.mxu0 %v10565_v30 }
  0x91   :  { %8447 = vmatprep.subr.mxu0 %v10392_v1  ;;  %v10658_v10 = vpack.c.bf16 %v1573_v8, %v1570_v7  ;;  %v1656_v12 = vsub.f32 %v1557_v6, %v1573_v8 }
  0x93   :  { %v1657_v15 = vand.u32 4294901760, %v1656_v12  ;;  %v9554_v21 = vpack.c.bf16 %v1656_v12, %v1649_v11 }
  0x94   :  { %8448 = vmatpush3.msra.mxu0 %v10568_v33 }
  0x95   :  { %9532 = vmatprep.subr.bf16.mxu0 %v10390_v0  ;;  %v1658_v17 = vsub.f32 %v1656_v12, %v1657_v15  ;;  %v9560_v22 = vpack.c.bf16 %v1657_v15, %v1650_v14 }
  0x97   :  { %v1659_v19 = vand.u32 4294901760, %v1658_v17 }
  0x99   :  { %v9551_v20 = vpack.c.bf16 %v1659_v19, %v1652_v18 }
 0x162   :  { %v577_v44 = vpop.f32.mrb[0].mxu0 }
 0x163   :  { %v10087_v45 = vadd.f32 %v7804_v43, %v577_v44  ;;  %v8388_v46 = vpop.f32.mrb[1].mxu0 }
 0x165   :  { %v588_v47 = vsel %vm586_vm2, %v10087_v45, 0 }
 0x166   :  { %v658_v49 = vand.u32 4294901760, %v588_v47 }
 0x168   :  { %v659_v50 = vsub.f32 %v588_v47, %v658_v49 }
 0x16a   :  { %v660_v52 = vand.u32 4294901760, %v659_v50 }
 0x16c   :  { %v661_v53 = vsub.f32 %v659_v50, %v660_v52 }
 0x16e   :  { %v662_v55 = vand.u32 4294901760, %v661_v53  ;;  %v2045_v53 = vld [vmem:[%s11519_s5 + $0x20] sm:$0xff] }
 0x170   :  { %8396 = vmatmul.mubr.f32.vlgmr.msra.gmra.mrb[0].mxu1 %v662_v55  ;;  %v2068_v55 = vand.u32 4294901760, %v2045_v53 }
 0x171   :  { %9516 = vmatpush3.bf16.msra.mxu1 %v9515_v40  ;;  %8404 = vmatprep.mubr.msk.f32.mxu1 %vm10391_vm0, %v10392_v1 }
 0x172   :  { %8402 = vmatprep.subr.mxu1 %v10392_v1  ;;  %v2168_v16 = vsub.f32 %v2045_v53, %v2068_v55 }
 0x175   :  { %8403 = vmatpush3.msra.mxu1 %v687_v56 }
 0x176   :  { %9517 = vmatprep.subr.bf16.mxu1 %v10390_v0 }
 0x178   :  { %8405 = vmatmul.mubr.f32.vlgmr.msra.gmra.mrb[0].mxu1 %v658_v49 }
 0x179   :  { %9519 = vmatpush3.bf16.msra.mxu1 %v10577_v41  ;;  %8413 = vmatprep.mubr.msk.f32.mxu1 %vm10391_vm0, %v10392_v1 }
 0x17a   :  { %8411 = vmatprep.subr.mxu1 %v10392_v1 }
 0x17d   :  { %8412 = vmatpush3.msra.mxu1 %v684_v48 }
 0x17e   :  { %9520 = vmatprep.subr.bf16.mxu1 %v10390_v0 }
 0x180   :  { %8414 = vmatmul.mubr.f32.vlgmr.msra.gmra.mrb[0].mxu1 %v659_v50 }
 0x181   :  { %9522 = vmatpush3.bf16.msra.mxu1 %v10565_v30  ;;  %8422 = vmatprep.mubr.msk.f32.mxu1 %vm10391_vm0, %v10392_v1 }
 0x182   :  { %8420 = vmatprep.subr.mxu1 %v10392_v1 }
 0x185   :  { %8421 = vmatpush3.msra.mxu1 %v10568_v33 }
 0x186   :  { %9523 = vmatprep.subr.bf16.mxu1 %v10390_v0 }
 0x188   :  { %8423 = vmatmul.mubr.f32.vlgmr.msra.gmra.mrb[0].mxu1 %v660_v52 }
 0x189   :  { %9525 = vmatpush3.bf16.msra.mxu1 %v10579_v42  ;;  %8431 = vmatprep.mubr.msk.f32.mxu1 %vm10391_vm0, %v10392_v1 }
 0x18a   :  { %8429 = vmatprep.subr.mxu1 %v10392_v1 }
 0x18d   :  { %8430 = vmatpush3.msra.mxu1 %v10583_v51 }
 0x18e   :  { %9526 = vmatprep.subr.bf16.mxu1 %v10390_v0 }
 0x190   :  { %8432 = vmatmul.mubr.f32.vlgmr.msra.gmra.mrb[0].mxu1 %v658_v49 }
 0x191   :  { %9528 = vmatpush3.bf16.msra.mxu1 %v10565_v30  ;;  %8440 = vmatprep.mubr.msk.f32.mxu1 %vm10391_vm0, %v10392_v1 }
 0x192   :  { %8438 = vmatprep.subr.mxu1 %v10392_v1 }
 0x195   :  { %8439 = vmatpush3.msra.mxu1 %v10568_v33 }
 0x196   :  { %9547 = vmatprep.subr.bf16.mxu1 %v10390_v0 }
 0x198   :  { %8441 = vmatmul.mubr.f32.vlgmr.msra.gmra.mrb[0].mxu1 %v658_v49  ;;  %v2044_v49 = vld [vmem:[%s11519_s5 + $0x18] sm:$0xff] }
 0x199   :  { %8503 = vmatprep.mubr.msk.f32.mxu1 %vm10391_vm0, %v10392_v1  ;;  %9549 = vmatpush3.bf16.msra.mxu1 %v10658_v10 }
 0x19a   :  { %8501 = vmatprep.subr.mxu1 %v10392_v1 }
 0x19d   :  { %8502 = vmatpush3.msra.mxu1 %v10661_v13 }
 0x19e   :  { %9550 = vmatprep.subr.bf16.mxu1 %v10390_v0 }
 0x26b   :  { %v1058_v57 = vpop.f32.mrb[0].mxu1 }
 0x26c   :  { %v10615_v58 = vsub.f32 %v10087_v45, %v1058_v57  ;;  %v8442_v59 = vpop.f32.mrb[1].mxu1 }
 0x26d   :  { %v2147_v59 = vsub.f32 %v10674_v24, %v2059_v26 }
 0x26e   :  { %v1063_v60 = vmul.f32 %v10615_v58, %v10615_v58 }
 0x270   :  { %v1065_v61 = vsel %vm586_vm2, %v1063_v60, 0  ;;  %v2047_v60 = vld [vmem:[%s11519_s5 + $0x30] sm:$0xff] }
 0x271   :  { %v1135_v62 = vand.u32 4294901760, %v1065_v61 }
 0x273   :  { %v1136_v63 = vsub.f32 %v1065_v61, %v1135_v62  ;;  %v2048_v61 = vld [vmem:[%s11519_s5 + $0x38] sm:$0xff] }
 0x275   :  { %v1137_v2 = vand.u32 4294901760, %v1136_v63 }
 0x277   :  { %v1138_v3 = vsub.f32 %v1136_v63, %v1137_v2 }
 0x279   :  { %v1139_v4 = vand.u32 4294901760, %v1138_v3  ;;  %v2148_v3 = vand.u32 4294901760, %v2147_v59 }
 0x27b   :  { %8450 = vmatmul.mubr.f32.vlgmr.msra.gmra.mrb[2].mxu0 %v1139_v4  ;;  %v2149_v6 = vsub.f32 %v2147_v59, %v2148_v3 }
 0x27c   :  { %9534 = vmatpush3.bf16.msra.mxu0 %v9515_v40  ;;  %8458 = vmatprep.mubr.msk.f32.mxu0 %vm10391_vm0, %v10392_v1 }
 0x27d   :  { %8456 = vmatprep.subr.mxu0 %v10392_v1 }
 0x280   :  { %8457 = vmatpush3.msra.mxu0 %v687_v56  ;;  %v2071_v56 = vand.u32 4294901760, %v2046_v54 }
 0x281   :  { %9535 = vmatprep.subr.bf16.mxu0 %v10390_v0 }
 0x282   :  { %v10731_v57 = vpack.c.bf16 %v2071_v56, %v2068_v55  ;;  %v2175_v17 = vsub.f32 %v2046_v54, %v2071_v56 }
 0x283   :  { %8459 = vmatmul.mubr.f32.vlgmr.msra.gmra.mrb[2].mxu0 %v1135_v62 }
 0x284   :  { %9537 = vmatpush3.bf16.msra.mxu0 %v10577_v41  ;;  %8467 = vmatprep.mubr.msk.f32.mxu0 %vm10391_vm0, %v10392_v1 }
 0x285   :  { %8465 = vmatprep.subr.mxu0 %v10392_v1 }
 0x288   :  { %8466 = vmatpush3.msra.mxu0 %v684_v48  ;;  %v2043_v48 = vld [vmem:[%s11519_s5 + $0x10] sm:$0xff] }
 0x289   :  { %9538 = vmatprep.subr.bf16.mxu0 %v10390_v0  ;;  %v2062_v50 = vand.u32 4294901760, %v2043_v48 }
 0x28b   :  { %8468 = vmatmul.mubr.f32.vlgmr.msra.gmra.mrb[2].mxu0 %v1136_v63  ;;  %v2077_v63 = vand.u32 4294901760, %v2048_v61  ;;  %v2154_v7 = vsub.f32 %v2043_v48, %v2062_v50 }
 0x28c   :  { %9540 = vmatpush3.bf16.msra.mxu0 %v10565_v30  ;;  %8476 = vmatprep.mubr.msk.f32.mxu0 %vm10391_vm0, %v10392_v1 }
 0x28d   :  { %8474 = vmatprep.subr.mxu0 %v10392_v1  ;;  %v2155_v11 = vand.u32 4294901760, %v2154_v7  ;;  %v2189_v26 = vsub.f32 %v2048_v61, %v2077_v63 }
 0x28f   :  { %v2156_v14 = vsub.f32 %v2154_v7, %v2155_v11 }
 0x290   :  { %8475 = vmatpush3.msra.mxu0 %v10568_v33 }
 0x291   :  { %9541 = vmatprep.subr.bf16.mxu0 %v10390_v0  ;;  %v2157_v18 = vand.u32 4294901760, %v2156_v14 }
 0x293   :  { %8477 = vmatmul.mubr.f32.vlgmr.msra.gmra.mrb[2].mxu0 %v1137_v2 }
 0x294   :  { %9543 = vmatpush3.bf16.msra.mxu0 %v10579_v42  ;;  %8485 = vmatprep.mubr.msk.f32.mxu0 %vm10391_vm0, %v10392_v1  ;;  %v1664_v42 = vand.u32 4294901760, %v1663_v38 }
 0x295   :  { %8483 = vmatprep.subr.mxu0 %v10392_v1 }
 0x296   :  { %v1665_v45 = vsub.f32 %v1663_v38, %v1664_v42 }
 0x298   :  { %8484 = vmatpush3.msra.mxu0 %v10583_v51  ;;  %v1666_v47 = vand.u32 4294901760, %v1665_v45  ;;  %v2065_v51 = vand.u32 4294901760, %v2044_v49 }
 0x299   :  { %9544 = vmatprep.subr.bf16.mxu0 %v10390_v0 }
 0x29a   :  { %v10721_v52 = vpack.c.bf16 %v2065_v51, %v2062_v50  ;;  %v2161_v8 = vsub.f32 %v2044_v49, %v2065_v51 }
 0x29b   :  { %8486 = vmatmul.mubr.f32.vlgmr.msra.gmra.mrb[2].mxu0 %v1135_v62 }
 0x29c   :  { %9546 = vmatpush3.bf16.msra.mxu0 %v10565_v30  ;;  %8494 = vmatprep.mubr.msk.f32.mxu0 %vm10391_vm0, %v10392_v1  ;;  %v2162_v12 = vand.u32 4294901760, %v2161_v8 }
 0x29d   :  { %8492 = vmatprep.subr.mxu0 %v10392_v1 }
 0x29e   :  { %v2163_v15 = vsub.f32 %v2161_v8, %v2162_v12 }
 0x2a0   :  { %8493 = vmatpush3.msra.mxu0 %v10568_v33  ;;  %v2164_v19 = vand.u32 4294901760, %v2163_v15  ;;  %v3156_v15 = vld [vmem:[%s11520_s6 + $0x28] sm:$0xff] }
 0x2a1   :  { %9565 = vmatprep.subr.bf16.mxu0 %v10390_v0 }
 0x2a3   :  { %8495 = vmatmul.mubr.f32.vlgmr.msra.gmra.mrb[2].mxu0 %v1135_v62  ;;  %v2074_v62 = vand.u32 4294901760, %v2047_v60 }
 0x2a4   :  { %8567 = vmatprep.mubr.msk.f32.mxu0 %vm10391_vm0, %v10392_v1  ;;  %9567 = vmatpush3.bf16.msra.mxu0 %v10682_v27 }
 0x2a5   :  { %9568 = vmatprep.subr.bf16.mxu0 %v10390_v0  ;;  %v10747_v4 = vpack.c.bf16 %v2077_v63, %v2074_v62 }
 0x2a8   :  { %9570 = vmatpush3.bf16.msra.mxu0 %v10721_v52 }
 0x2a9   :  { %9571 = vmatprep.subr.bf16.mxu0 %v10390_v0 }
 0x2ac   :  { %9573 = vmatpush3.bf16.msra.mxu0 %v10731_v57 }
 0x2ad   :  { %9574 = vmatprep.subr.bf16.mxu0 %v10390_v0 }
 0x2b0   :  { %9576 = vmatpush3.bf16.msra.mxu0 %v10747_v4 }
 0x2b1   :  { %9577 = vmatprep.subr.bf16.mxu0 %v10390_v0 }
 0x376   :  { %v1535_v28 = vpop.f32.mrb[2].mxu0 }
 0x377   :  { %v10088_v29 = vadd.f32 1e-05, %v1535_v28  ;;  %v8496_v30 = vpop.f32.mrb[3].mxu0 }
 0x379   :  { %10257 = vrsqrt.f32 %v10088_v29 }
 0x383   :  { %v10258_v31 = vpop.eup %10257 }
 0x384   :  { %v1540_v33 = vmul.f32 %v10258_v31, %v10615_v58  ;;  %v2140_v58 = vsub.f32 %v10669_v23, %v2056_v25  ;;  %v2182_v25 = vsub.f32 %v2047_v60, %v2074_v62  ;;  %v2190_v31 = vand.u32 4294901760, %v2189_v26 }
 0x386   :  { %v1547_v35 = vmul.f32 %v7805_v32, %v1540_v33  ;;  %v2141_v2 = vand.u32 4294901760, %v2140_v58  ;;  %v2183_v30 = vand.u32 4294901760, %v2182_v25 }
 0x388   :  { %v1554_v36 = vadd.f32 %v7806_v34, %v1547_v35  ;;  %v2142_v5 = vsub.f32 %v2140_v58, %v2141_v2  ;;  %v2184_v33 = vsub.f32 %v2182_v25, %v2183_v30  ;;  %v2191_v34 = vsub.f32 %v2189_v26, %v2190_v31 }
 0x389   :  { %v10769_v45 = vpack.c.bf16 %v2190_v31, %v2183_v30 }
 0x38a   :  { %v1555_v37 = vmax.f32 %v1554_v36, 0.0  ;;  %v2143_v9 = vand.u32 4294901760, %v2142_v5  ;;  %v2185_v35 = vand.u32 4294901760, %v2184_v33  ;;  %v2192_v36 = vand.u32 4294901760, %v2191_v34 }
 0x38c   :  { %v1567_v39 = vsel %vm586_vm2, %v1555_v37, 0  ;;  %v10757_v37 = vpack.c.bf16 %v2192_v36, %v2185_v35 }
 0x38d   :  { %v1637_v40 = vand.u32 4294901760, %v1567_v39 }
 0x38f   :  { %v1638_v41 = vsub.f32 %v1567_v39, %v1637_v40  ;;  %v9593_v39 = vpack.c.bf16 %v2161_v8, %v2154_v7 }
 0x391   :  { %v1639_v43 = vand.u32 4294901760, %v1638_v41 }
 0x393   :  { %v1640_v44 = vsub.f32 %v1638_v41, %v1639_v43 }
 0x395   :  { %v1641_v46 = vand.u32 4294901760, %v1640_v44 }
 0x397   :  { %8504 = vmatmul.mubr.f32.vlgmr.msra.gmra.mrb[2].mxu1 %v1641_v46  ;;  %v7807_v46 = vld [vmem:[#allocation4 + $0x3] ss:$0 sm:$0xff] }
 0x398   :  { %9552 = vmatpush3.bf16.msra.mxu1 %v9551_v20  ;;  %8512 = vmatprep.mubr.msk.f32.mxu1 %vm10391_vm0, %v10392_v1  ;;  %v2169_v20 = vand.u32 4294901760, %v2168_v16 }
 0x399   :  { %8510 = vmatprep.subr.mxu1 %v10392_v1 }
 0x39a   :  { %v2170_v23 = vsub.f32 %v2168_v16, %v2169_v20 }
 0x39c   :  { %8511 = vmatpush3.msra.mxu1 %v1666_v47  ;;  %v2171_v28 = vand.u32 4294901760, %v2170_v23 }
 0x39d   :  { %9553 = vmatprep.subr.bf16.mxu1 %v10390_v0 }
 0x39f   :  { %8513 = vmatmul.mubr.f32.vlgmr.msra.gmra.mrb[2].mxu1 %v1637_v40 }
 0x3a0   :  { %9555 = vmatpush3.bf16.msra.mxu1 %v9554_v21  ;;  %8521 = vmatprep.mubr.msk.f32.mxu1 %vm10391_vm0, %v10392_v1  ;;  %v2176_v21 = vand.u32 4294901760, %v2175_v17 }
 0x3a1   :  { %8519 = vmatprep.subr.mxu1 %v10392_v1 }
 0x3a2   :  { %v2177_v24 = vsub.f32 %v2175_v17, %v2176_v21  ;;  %v10767_v44 = vpack.c.bf16 %v2176_v21, %v2169_v20 }
 0x3a4   :  { %8520 = vmatpush3.msra.mxu1 %v1663_v38  ;;  %v2178_v29 = vand.u32 4294901760, %v2177_v24  ;;  %v9590_v38 = vpack.c.bf16 %v2147_v59, %v2140_v58 }
 0x3a5   :  { %9556 = vmatprep.subr.bf16.mxu1 %v10390_v0 }
 0x3a6   :  { %v10755_v32 = vpack.c.bf16 %v2178_v29, %v2171_v28 }
 0x3a7   :  { %8522 = vmatmul.mubr.f32.vlgmr.msra.gmra.mrb[2].mxu1 %v1638_v41  ;;  %v9599_v41 = vpack.c.bf16 %v2189_v26, %v2182_v25 }
 0x3a8   :  { %9558 = vmatpush3.bf16.msra.mxu1 %v10658_v10  ;;  %8530 = vmatprep.mubr.msk.f32.mxu1 %vm10391_vm0, %v10392_v1 }
 0x3a9   :  { %8528 = vmatprep.subr.mxu1 %v10392_v1 }
 0x3ac   :  { %8529 = vmatpush3.msra.mxu1 %v10661_v13 }
 0x3ad   :  { %9559 = vmatprep.subr.bf16.mxu1 %v10390_v0 }
 0x3af   :  { %8531 = vmatmul.mubr.f32.vlgmr.msra.gmra.mrb[2].mxu1 %v1639_v43  ;;  %v10765_v43 = vpack.c.bf16 %v2162_v12, %v2155_v11  ;;  %v3154_v11 = vld [vmem:[%s11520_s6 + $0x18] sm:$0xff]  ;;  %v3155_v12 = vld [vmem:[%s11520_s6 + $0x20] sm:$0xff] }
 0x3b0   :  { %9561 = vmatpush3.bf16.msra.mxu1 %v9560_v22  ;;  %8539 = vmatprep.mubr.msk.f32.mxu1 %vm10391_vm0, %v10392_v1  ;;  %v10753_v22 = vpack.c.bf16 %v2164_v19, %v2157_v18  ;;  %v3179_v14 = vand.u32 4294901760, %v3154_v11  ;;  %v3158_v18 = vld [vmem:[%s11520_s6 + $0x38] sm:$0xff]  ;;  %v3185_v19 = vand.u32 4294901760, %v3156_v15 }
 0x3b1   :  { %8537 = vmatprep.subr.mxu1 %v10392_v1  ;;  %v3191_v21 = vand.u32 4294901760, %v3158_v18 }
 0x3b2   :  { %v10917_v24 = vsub.f32 %v3154_v11, %v3179_v14  ;;  %v10921_v26 = vsub.f32 %v3156_v15, %v3185_v19 }
 0x3b3   :  { %v10928_v30 = vsub.f32 %v3158_v18, %v3191_v21 }
 0x3b4   :  { %8538 = vmatpush3.msra.mxu1 %v1664_v42  ;;  %v10763_v42 = vpack.c.bf16 %v2148_v3, %v2141_v2 }
 0x3b5   :  { %9562 = vmatprep.subr.bf16.mxu1 %v10390_v0 }
 0x3b7   :  { %8540 = vmatmul.mubr.f32.vlgmr.msra.gmra.mrb[2].mxu1 %v1637_v40 }
 0x3b8   :  { %9564 = vmatpush3.bf16.msra.mxu1 %v10658_v10  ;;  %8548 = vmatprep.mubr.msk.f32.mxu1 %vm10391_vm0, %v10392_v1  ;;  %v2150_v10 = vand.u32 4294901760, %v2149_v6 }
 0x3b9   :  { %8546 = vmatprep.subr.mxu1 %v10392_v1 }
 0x3bc   :  { %8547 = vmatpush3.msra.mxu1 %v10661_v13  ;;  %v10751_v13 = vpack.c.bf16 %v2150_v10, %v2143_v9  ;;  %v3153_v10 = vld [vmem:[%s11520_s6 + $0x10] sm:$0xff] }
 0x3bd   :  { %9661 = vmatprep.subr.bf16.mxu1 %v10390_v0 }
 0x3bf   :  { %8549 = vmatmul.mubr.f32.vlgmr.msra.gmra.mrb[2].mxu1 %v1637_v40  ;;  %v9596_v40 = vpack.c.bf16 %v2175_v17, %v2168_v16  ;;  %v3182_v16 = vand.u32 4294901760, %v3155_v12  ;;  %v3157_v17 = vld [vmem:[%s11520_s6 + $0x30] sm:$0xff] }
 0x3c0   :  { %8719 = vmatprep.mubr.msk.f32.mxu1 %vm10391_vm0, %v10392_v1  ;;  %9663 = vmatpush3.bf16.msra.mxu1 %v9590_v38  ;;  %v3188_v20 = vand.u32 4294901760, %v3157_v17 }
 0x3c1   :  { %9664 = vmatprep.subr.bf16.mxu1 %v10390_v0  ;;  %v10919_v25 = vsub.f32 %v3155_v12, %v3182_v16  ;;  %v10926_v29 = vpack.c.bf16 %v3185_v19, %v3182_v16  ;;  %v7809_v16 = vld [vmem:[#allocation4 + $0x5] ss:$0 sm:$0xff] }
 0x3c2   :  { %v10923_v28 = vsub.f32 %v3157_v17, %v3188_v20  ;;  %v10932_v31 = vpack.c.bf16 %v3191_v21, %v3188_v20 }
 0x3c4   :  { %9666 = vmatpush3.bf16.msra.mxu1 %v9593_v39 }
 0x3c5   :  { %9667 = vmatprep.subr.bf16.mxu1 %v10390_v0 }
 0x3c8   :  { %9669 = vmatpush3.bf16.msra.mxu1 %v9596_v40 }
 0x3c9   :  { %9670 = vmatprep.subr.bf16.mxu1 %v10390_v0 }
 0x3cc   :  { %9672 = vmatpush3.bf16.msra.mxu1 %v9599_v41 }
 0x3cd   :  { %9673 = vmatprep.subr.bf16.mxu1 %v10390_v0 }
 0x492   :  { %v2037_v47 = vpop.f32.mrb[2].mxu1 }
 0x493   :  { %v10771_v48 = vadd.f32 %v7807_v46, %v2037_v47  ;;  %v8550_v49 = vpop.f32.mrb[3].mxu1  ;;  %v3290_v46 = vand.u32 4294901760, %v10921_v26 }
 0x495   :  { %v2053_v50 = vsel %vm2051_vm3, %v10771_v48, 0  ;;  %v3291_v49 = vsub.f32 %v10921_v26, %v3290_v46 }
 0x496   :  { %v2128_v51 = vand.u32 4294901760, %v2053_v50 }
 0x498   :  { %v2129_v53 = vsub.f32 %v2053_v50, %v2128_v51 }
 0x49a   :  { %v2130_v54 = vand.u32 4294901760, %v2129_v53 }
 0x49c   :  { %v2131_v55 = vsub.f32 %v2129_v53, %v2130_v54 }
 0x49e   :  { %v2132_v56 = vand.u32 4294901760, %v2131_v55 }
 0x4a0   :  { %8568 = vmatmul.mubr.f32.vlgmr.msra.gmra.mrb[4].mxu0 %v2132_v56 }
 0x4a1   :  { %9579 = vmatpush3.bf16.msra.mxu0 %v10751_v13  ;;  %8586 = vmatprep.mubr.msk.f32.mxu0 %vm10391_vm0, %v10392_v1 }
 0x4a2   :  { %9580 = vmatprep.subr.bf16.mxu0 %v10390_v0 }
 0x4a5   :  { %9582 = vmatpush3.bf16.msra.mxu0 %v10753_v22 }
 0x4a6   :  { %9583 = vmatprep.subr.bf16.mxu0 %v10390_v0 }
 0x4a9   :  { %9585 = vmatpush3.bf16.msra.mxu0 %v10755_v32 }
 0x4aa   :  { %9586 = vmatprep.subr.bf16.mxu0 %v10390_v0 }
 0x4ad   :  { %9588 = vmatpush3.bf16.msra.mxu0 %v10757_v37 }
 0x4ae   :  { %9589 = vmatprep.subr.bf16.mxu0 %v10390_v0 }
 0x4b0   :  { %8587 = vmatmul.mubr.f32.vlgmr.msra.gmra.mrb[4].mxu0 %v2128_v51 }
 0x4b1   :  { %9591 = vmatpush3.bf16.msra.mxu0 %v9590_v38  ;;  %8605 = vmatprep.mubr.msk.f32.mxu0 %vm10391_vm0, %v10392_v1 }
 0x4b2   :  { %9592 = vmatprep.subr.bf16.mxu0 %v10390_v0 }
 0x4b5   :  { %9594 = vmatpush3.bf16.msra.mxu0 %v9593_v39  ;;  %v3276_v39 = vand.u32 4294901760, %v10917_v24 }
 0x4b6   :  { %9595 = vmatprep.subr.bf16.mxu0 %v10390_v0 }
 0x4b9   :  { %9597 = vmatpush3.bf16.msra.mxu0 %v9596_v40 }
 0x4ba   :  { %9598 = vmatprep.subr.bf16.mxu0 %v10390_v0 }
 0x4bd   :  { %9600 = vmatpush3.bf16.msra.mxu0 %v9599_v41 }
 0x4be   :  { %9601 = vmatprep.subr.bf16.mxu0 %v10390_v0 }
 0x4c0   :  { %8606 = vmatmul.mubr.f32.vlgmr.msra.gmra.mrb[4].mxu0 %v2129_v53  ;;  %v3297_v53 = vand.u32 4294901760, %v10923_v28 }
 0x4c1   :  { %9603 = vmatpush3.bf16.msra.mxu0 %v10682_v27  ;;  %8624 = vmatprep.mubr.msk.f32.mxu0 %vm10391_vm0, %v10392_v1 }
 0x4c2   :  { %9604 = vmatprep.subr.bf16.mxu0 %v10390_v0  ;;  %v3298_v56 = vsub.f32 %v10923_v28, %v3297_v53 }
 0x4c5   :  { %9606 = vmatpush3.bf16.msra.mxu0 %v10721_v52 }
 0x4c6   :  { %9607 = vmatprep.subr.bf16.mxu0 %v10390_v0 }
 0x4c9   :  { %9609 = vmatpush3.bf16.msra.mxu0 %v10731_v57 }
 0x4ca   :  { %9610 = vmatprep.subr.bf16.mxu0 %v10390_v0 }
 0x4cd   :  { %9612 = vmatpush3.bf16.msra.mxu0 %v10747_v4 }
 0x4ce   :  { %9613 = vmatprep.subr.bf16.mxu0 %v10390_v0 }
 0x4d0   :  { %8625 = vmatmul.mubr.f32.vlgmr.msra.gmra.mrb[4].mxu0 %v2130_v54  ;;  %v3304_v54 = vand.u32 4294901760, %v10928_v30 }
 0x4d1   :  { %9615 = vmatpush3.bf16.msra.mxu0 %v10763_v42  ;;  %8643 = vmatprep.mubr.msk.f32.mxu0 %vm10391_vm0, %v10392_v1 }
 0x4d2   :  { %9616 = vmatprep.subr.bf16.mxu0 %v10390_v0 }
 0x4d5   :  { %9618 = vmatpush3.bf16.msra.mxu0 %v10765_v43 }
 0x4d6   :  { %9619 = vmatprep.subr.bf16.mxu0 %v10390_v0 }
 0x4d9   :  { %9621 = vmatpush3.bf16.msra.mxu0 %v10767_v44 }
 0x4da   :  { %9622 = vmatprep.subr.bf16.mxu0 %v10390_v0 }
 0x4dd   :  { %9624 = vmatpush3.bf16.msra.mxu0 %v10769_v45 }
 0x4de   :  { %9625 = vmatprep.subr.bf16.mxu0 %v10390_v0 }
 0x4e0   :  { %8644 = vmatmul.mubr.f32.vlgmr.msra.gmra.mrb[4].mxu0 %v2128_v51 }
 0x4e1   :  { %9627 = vmatpush3.bf16.msra.mxu0 %v10682_v27  ;;  %8662 = vmatprep.mubr.msk.f32.mxu0 %vm10391_vm0, %v10392_v1 }
 0x4e2   :  { %9628 = vmatprep.subr.bf16.mxu0 %v10390_v0 }
 0x4e5   :  { %9630 = vmatpush3.bf16.msra.mxu0 %v10721_v52 }
 0x4e6   :  { %9631 = vmatprep.subr.bf16.mxu0 %v10390_v0 }
 0x4e9   :  { %9633 = vmatpush3.bf16.msra.mxu0 %v10731_v57 }
 0x4ea   :  { %9634 = vmatprep.subr.bf16.mxu0 %v10390_v0 }
 0x4ed   :  { %9636 = vmatpush3.bf16.msra.mxu0 %v10747_v4 }
 0x4ee   :  { %9637 = vmatprep.subr.bf16.mxu0 %v10390_v0 }
 0x4f0   :  { %8663 = vmatmul.mubr.f32.vlgmr.msra.gmra.mrb[4].mxu0 %v2128_v51  ;;  %v3292_v51 = vand.u32 4294901760, %v3291_v49 }
 0x4f1   :  { %9639 = vmatpush3.bf16.msra.mxu0 %v10682_v27  ;;  %8681 = vmatprep.mubr.msk.f32.mxu0 %vm10391_vm0, %v10392_v1 }
 0x4f2   :  { %9640 = vmatprep.subr.bf16.mxu0 %v10390_v0 }
 0x4f5   :  { %9642 = vmatpush3.bf16.msra.mxu0 %v10721_v52 }
 0x4f6   :  { %9643 = vmatprep.subr.bf16.mxu0 %v10390_v0 }
 0x4f9   :  { %9645 = vmatpush3.bf16.msra.mxu0 %v10731_v57 }
 0x4fa   :  { %9646 = vmatprep.subr.bf16.mxu0 %v10390_v0 }
 0x4fd   :  { %9648 = vmatpush3.bf16.msra.mxu0 %v10747_v4 }
 0x4fe   :  { %9649 = vmatprep.subr.bf16.mxu0 %v10390_v0 }
 0x5c3   :  { %v2588_v58 = vpop.f32.mrb[4].mxu0 }
 0x5c4   :  { %v10832_v59 = vsub.f32 %v10771_v48, %v2588_v58  ;;  %v8664_v60 = vpop.f32.mrb[5].mxu0  ;;  %v3305_v58 = vsub.f32 %v10928_v30, %v3304_v54 }
 0x5c5   :  { %v3299_v60 = vand.u32 4294901760, %v3298_v56 }
 0x5c6   :  { %v2593_v61 = vmul.f32 %v10832_v59, %v10832_v59 }
 0x5c8   :  { %v2595_v62 = vsel %vm2051_vm3, %v2593_v61, 0  ;;  %v3306_v61 = vand.u32 4294901760, %v3305_v58 }
 0x5c9   :  { %v2670_v63 = vand.u32 4294901760, %v2595_v62 }
 0x5cb   :  { %v2671_v2 = vsub.f32 %v2595_v62, %v2670_v63  ;;  %v9731_v62 = vpack.c.bf16 %v3306_v61, %v3299_v60  ;;  %v4196_v61 = vld [vmem:[#allocation7] sm:$0xff] }
 0x5cd   :  { %8720 = vmatmul.mubr.f32.vlgmr.msra.gmra.mrb[4].mxu1 %v2671_v2  ;;  %v2672_v3 = vand.u32 4294901760, %v2671_v2 }
 0x5ce   :  { %9675 = vmatpush3.bf16.msra.mxu1 %v10682_v27  ;;  %8738 = vmatprep.mubr.msk.f32.mxu1 %vm10391_vm0, %v10392_v1 }
 0x5cf   :  { %9676 = vmatprep.subr.bf16.mxu1 %v10390_v0  ;;  %v2673_v5 = vsub.f32 %v2671_v2, %v2672_v3 }
 0x5d1   :  { %v2674_v6 = vand.u32 4294901760, %v2673_v5  ;;  %v9743_v5 = vpack.c.bf16 %v10928_v30, %v10923_v28 }
 0x5d2   :  { %9678 = vmatpush3.bf16.msra.mxu1 %v10721_v52 }
 0x5d3   :  { %8682 = vmatmul.mubr.f32.vlgmr.msra.gmra.mrb[6].mxu0 %v2674_v6  ;;  %9679 = vmatprep.subr.bf16.mxu1 %v10390_v0 }
 0x5d4   :  { %9651 = vmatpush3.bf16.msra.mxu0 %v10751_v13  ;;  %8700 = vmatprep.mubr.msk.f32.mxu0 %vm10391_vm0, %v10392_v1  ;;  %v3176_v13 = vand.u32 4294901760, %v3153_v10 }
 0x5d5   :  { %9652 = vmatprep.subr.bf16.mxu0 %v10390_v0 }
 0x5d6   :  { %9681 = vmatpush3.bf16.msra.mxu1 %v10731_v57  ;;  %v10915_v23 = vsub.f32 %v3153_v10, %v3176_v13 }
 0x5d7   :  { %9682 = vmatprep.subr.bf16.mxu1 %v10390_v0 }
 0x5d8   :  { %9654 = vmatpush3.bf16.msra.mxu0 %v10753_v22  ;;  %v10913_v22 = vpack.c.bf16 %v3179_v14, %v3176_v13  ;;  %v3269_v38 = vand.u32 4294901760, %v10915_v23  ;;  %v9737_v2 = vpack.c.bf16 %v10917_v24, %v10915_v23 }
 0x5d9   :  { %9655 = vmatprep.subr.bf16.mxu0 %v10390_v0 }
 0x5da   :  { %9684 = vmatpush3.bf16.msra.mxu1 %v10747_v4  ;;  %v3270_v41 = vsub.f32 %v10915_v23, %v3269_v38 }
 0x5db   :  { %9685 = vmatprep.subr.bf16.mxu1 %v10390_v0 }
 0x5dc   :  { %9657 = vmatpush3.bf16.msra.mxu0 %v10755_v32 }
 0x5dd   :  { %8739 = vmatmul.mubr.f32.vlgmr.msra.gmra.mrb[4].mxu1 %v2672_v3  ;;  %9658 = vmatprep.subr.bf16.mxu0 %v10390_v0  ;;  %v9740_v3 = vpack.c.bf16 %v10921_v26, %v10919_v25 }
 0x5de   :  { %9687 = vmatpush3.bf16.msra.mxu1 %v10763_v42  ;;  %8757 = vmatprep.mubr.msk.f32.mxu1 %vm10391_vm0, %v10392_v1  ;;  %v3277_v42 = vsub.f32 %v10917_v24, %v3276_v39 }
 0x5df   :  { %9688 = vmatprep.subr.bf16.mxu1 %v10390_v0 }
 0x5e0   :  { %9660 = vmatpush3.bf16.msra.mxu0 %v10757_v37 }
 0x5e1   :  { %9709 = vmatprep.subr.bf16.mxu0 %v10390_v0 }
 0x5e2   :  { %9690 = vmatpush3.bf16.msra.mxu1 %v10765_v43  ;;  %v3271_v43 = vand.u32 4294901760, %v3270_v41 }
 0x5e3   :  { %8701 = vmatmul.mubr.f32.vlgmr.msra.gmra.mrb[6].mxu0 %v2670_v63  ;;  %9691 = vmatprep.subr.bf16.mxu1 %v10390_v0 }
 0x5e4   :  { %8795 = vmatprep.mubr.msk.f32.mxu0 %vm10391_vm0, %v10392_v1 }
 0x5e6   :  { %9693 = vmatpush3.bf16.msra.mxu1 %v10767_v44  ;;  %v3278_v44 = vand.u32 4294901760, %v3277_v42 }
 0x5e7   :  { %9694 = vmatprep.subr.bf16.mxu1 %v10390_v0 }
 0x5e8   :  { %v9725_v47 = vpack.c.bf16 %v3278_v44, %v3271_v43  ;;  %v7810_v44 = vld [vmem:[#allocation4 + $0x6] ss:$0 sm:$0xff] }
 0x5ea   :  { %9696 = vmatpush3.bf16.msra.mxu1 %v10769_v45  ;;  %v3283_v45 = vand.u32 4294901760, %v10919_v25 }
 0x5eb   :  { %9697 = vmatprep.subr.bf16.mxu1 %v10390_v0 }
 0x5ec   :  { %v3284_v48 = vsub.f32 %v10919_v25, %v3283_v45 }
 0x5ed   :  { %8758 = vmatmul.mubr.f32.vlgmr.msra.gmra.mrb[4].mxu1 %v2670_v63 }
 0x5ee   :  { %9699 = vmatpush3.bf16.msra.mxu1 %v10682_v27  ;;  %8776 = vmatprep.mubr.msk.f32.mxu1 %vm10391_vm0, %v10392_v1  ;;  %v3151_v27 = vld [vmem:[%s11520_s6] sm:$0xff]  ;;  %v3285_v50 = vand.u32 4294901760, %v3284_v48 }
 0x5ef   :  { %9700 = vmatprep.subr.bf16.mxu1 %v10390_v0  ;;  %v3170_v7 = vand.u32 4294901760, %v3151_v27 }
 0x5f0   :  { %v9728_v55 = vpack.c.bf16 %v3292_v51, %v3285_v50 }
 0x5f1   :  { %v10889_v9 = vsub.f32 %v3151_v27, %v3170_v7  ;;  %v9761_v27 = vpack.c.bf16 %v3276_v39, %v3269_v38 }
 0x5f2   :  { %9702 = vmatpush3.bf16.msra.mxu1 %v10721_v52  ;;  %v3152_v52 = vld [vmem:[%s11520_s6 + $0x8] sm:$0xff] }
 0x5f3   :  { %9703 = vmatprep.subr.bf16.mxu1 %v10390_v0  ;;  %v3255_v32 = vand.u32 4294901760, %v10889_v9 }
 0x5f5   :  { %v3256_v34 = vsub.f32 %v10889_v9, %v3255_v32 }
 0x5f6   :  { %9705 = vmatpush3.bf16.msra.mxu1 %v10731_v57  ;;  %v3173_v57 = vand.u32 4294901760, %v3152_v52 }
 0x5f7   :  { %9706 = vmatprep.subr.bf16.mxu1 %v10390_v0  ;;  %v3257_v36 = vand.u32 4294901760, %v3256_v34 }
 0x5f8   :  { %v10887_v8 = vpack.c.bf16 %v3173_v57, %v3170_v7  ;;  %v9767_v7 = vpack.c.bf16 %v3304_v54, %v3297_v53 }
 0x5fa   :  { %9708 = vmatpush3.bf16.msra.mxu1 %v10747_v4  ;;  %v10891_v4 = vsub.f32 %v3152_v52, %v3173_v57  ;;  %9711 = vmatpush3.bf16.msra.mxu0 %v10887_v8  ;;  %v9764_v52 = vpack.c.bf16 %v3290_v46, %v3283_v45 }
 0x5fb   :  { %9781 = vmatprep.subr.bf16.mxu1 %v10390_v0  ;;  %9712 = vmatprep.subr.bf16.mxu0 %v10390_v0 }
 0x5fc   :  { %v3262_v33 = vand.u32 4294901760, %v10891_v4 }
 0x5fd   :  { %8777 = vmatmul.mubr.f32.vlgmr.msra.gmra.mrb[4].mxu1 %v2670_v63  ;;  %v9734_v63 = vpack.c.bf16 %v10891_v4, %v10889_v9 }
 0x5fe   :  { %8899 = vmatprep.mubr.msk.f32.mxu1 %vm10391_vm0, %v10392_v1  ;;  %9714 = vmatpush3.bf16.msra.mxu0 %v10913_v22  ;;  %v3263_v35 = vsub.f32 %v10891_v4, %v3262_v33  ;;  %v9758_v6 = vpack.c.bf16 %v3262_v33, %v3255_v32  ;;  %v7808_v4 = vld [vmem:[#allocation4 + $0x4] ss:$0 sm:$0xff] }
 0x5ff   :  { %9715 = vmatprep.subr.bf16.mxu0 %v10390_v0 }
 0x600   :  { %v3264_v37 = vand.u32 4294901760, %v3263_v35 }
 0x602   :  { %9717 = vmatpush3.bf16.msra.mxu0 %v10926_v29  ;;  %v9722_v40 = vpack.c.bf16 %v3264_v37, %v3257_v36 }
 0x603   :  { %9718 = vmatprep.subr.bf16.mxu0 %v10390_v0 }
 0x606   :  { %9720 = vmatpush3.bf16.msra.mxu0 %v10932_v31 }
 0x607   :  { %9721 = vmatprep.subr.bf16.mxu0 %v10390_v0 }
 0x6b6   :  { %v2787_v57 = vpop.f32.mrb[6].mxu0 }
 0x6b7   :  { %v8702_v10 = vpop.f32.mrb[7].mxu0  ;;  %v10090_v11 = vadd.f32 1e-05, %v2787_v57 }
 0x6d0   :  { %v3130_v12 = vpop.f32.mrb[4].mxu1 }
 0x6d1   :  { %v10091_v13 = vadd.f32 %v10090_v11, %v3130_v12  ;;  %v8778_v14 = vpop.f32.mrb[5].mxu1 }
 0x6d3   :  { %10259 = vrsqrt.f32 %v10091_v13 }
 0x6dd   :  { %v10260_v9 = vpop.eup %10259 }
 0x6de   :  { %v3135_v15 = vmul.f32 %v10260_v9, %v10832_v59  ;;  %v3706_v59 = vld [vmem:[%s11521_s7] sm:$0xff] }
 0x6e0   :  { %v3142_v17 = vmul.f32 %v7808_v4, %v3135_v15  ;;  %v7811_v15 = vld [vmem:[#allocation4 + $0x7] ss:$0 sm:$0xff] }
 0x6e2   :  { %v3149_v18 = vadd.f32 %v7809_v16, %v3142_v17 }
 0x6e4   :  { %v3150_v19 = vmax.f32 %v3149_v18, 0.0 }
 0x6e6   :  { %v3167_v20 = vsel %vm2051_vm3, %v3150_v19, 0 }
 0x6e7   :  { %v3242_v21 = vand.u32 4294901760, %v3167_v20 }
 0x6e9   :  { %v3243_v23 = vsub.f32 %v3167_v20, %v3242_v21 }
 0x6eb   :  { %v3244_v24 = vand.u32 4294901760, %v3243_v23 }
 0x6ed   :  { %v3245_v25 = vsub.f32 %v3243_v23, %v3244_v24 }
 0x6ef   :  { %v3246_v26 = vand.u32 4294901760, %v3245_v25 }
 0x6f1   :  { %8796 = vmatmul.mubr.f32.vlgmr.msra.gmra.mrb[8].mxu0 %v3246_v26 }
 0x6f2   :  { %9723 = vmatpush3.bf16.msra.mxu0 %v9722_v40  ;;  %8814 = vmatprep.mubr.msk.f32.mxu0 %vm10391_vm0, %v10392_v1 }
 0x6f3   :  { %9724 = vmatprep.subr.bf16.mxu0 %v10390_v0 }
 0x6f6   :  { %9726 = vmatpush3.bf16.msra.mxu0 %v9725_v47 }
 0x6f7   :  { %9727 = vmatprep.subr.bf16.mxu0 %v10390_v0 }
 0x6fa   :  { %9729 = vmatpush3.bf16.msra.mxu0 %v9728_v55 }
 0x6fb   :  { %9730 = vmatprep.subr.bf16.mxu0 %v10390_v0 }
 0x6fe   :  { %9732 = vmatpush3.bf16.msra.mxu0 %v9731_v62  ;;  %v4197_v62 = vld [vmem:[#allocation7 + $0x8] sm:$0xff] }
 0x6ff   :  { %9733 = vmatprep.subr.bf16.mxu0 %v10390_v0 }
 0x701   :  { %8815 = vmatmul.mubr.f32.vlgmr.msra.gmra.mrb[8].mxu0 %v3242_v21 }
 0x702   :  { %9735 = vmatpush3.bf16.msra.mxu0 %v9734_v63  ;;  %8833 = vmatprep.mubr.msk.f32.mxu0 %vm10391_vm0, %v10392_v1  ;;  %v4205_v63 = vand.u32 4294901760, %v4196_v61 }
 0x703   :  { %9736 = vmatprep.subr.bf16.mxu0 %v10390_v0 }
 0x706   :  { %9738 = vmatpush3.bf16.msra.mxu0 %v9737_v2  ;;  %v4208_v2 = vand.u32 4294901760, %v4197_v62 }
 0x707   :  { %9739 = vmatprep.subr.bf16.mxu0 %v10390_v0 }
 0x70a   :  { %9741 = vmatpush3.bf16.msra.mxu0 %v9740_v3  ;;  %v11037_v3 = vpack.c.bf16 %v4208_v2, %v4205_v63 }
 0x70b   :  { %9742 = vmatprep.subr.bf16.mxu0 %v10390_v0 }
 0x70e   :  { %9744 = vmatpush3.bf16.msra.mxu0 %v9743_v5  ;;  %v4284_v5 = vsub.f32 %v4196_v61, %v4205_v63 }
 0x70f   :  { %9745 = vmatprep.subr.bf16.mxu0 %v10390_v0 }
 0x711   :  { %8834 = vmatmul.mubr.f32.vlgmr.msra.gmra.mrb[8].mxu0 %v3243_v23 }
 0x712   :  { %9747 = vmatpush3.bf16.msra.mxu0 %v10887_v8  ;;  %8852 = vmatprep.mubr.msk.f32.mxu0 %vm10391_vm0, %v10392_v1 }
 0x713   :  { %9748 = vmatprep.subr.bf16.mxu0 %v10390_v0 }
 0x716   :  { %9750 = vmatpush3.bf16.msra.mxu0 %v10913_v22 }
 0x717   :  { %9751 = vmatprep.subr.bf16.mxu0 %v10390_v0 }
 0x71a   :  { %9753 = vmatpush3.bf16.msra.mxu0 %v10926_v29 }
 0x71b   :  { %9754 = vmatprep.subr.bf16.mxu0 %v10390_v0 }
 0x71e   :  { %9756 = vmatpush3.bf16.msra.mxu0 %v10932_v31 }
 0x71f   :  { %9757 = vmatprep.subr.bf16.mxu0 %v10390_v0 }
 0x721   :  { %8853 = vmatmul.mubr.f32.vlgmr.msra.gmra.mrb[8].mxu0 %v3244_v24 }
 0x722   :  { %9759 = vmatpush3.bf16.msra.mxu0 %v9758_v6  ;;  %8871 = vmatprep.mubr.msk.f32.mxu0 %vm10391_vm0, %v10392_v1  ;;  %v4291_v6 = vsub.f32 %v4197_v62, %v4208_v2 }
 0x723   :  { %9760 = vmatprep.subr.bf16.mxu0 %v10390_v0 }
 0x724   :  { %v4292_v57 = vand.u32 4294901760, %v4291_v6  ;;  %v11047_v9 = vpack.c.bf16 %v4291_v6, %v4284_v5 }
 0x726   :  { %9762 = vmatpush3.bf16.msra.mxu0 %v9761_v27  ;;  %v4198_v27 = vld [vmem:[#allocation7 + $0x10] sm:$0xff]  ;;  %v4293_v11 = vsub.f32 %v4291_v6, %v4292_v57 }
 0x727   :  { %9763 = vmatprep.subr.bf16.mxu0 %v10390_v0 }
 0x728   :  { %v4294_v13 = vand.u32 4294901760, %v4293_v11 }
 0x72a   :  { %9765 = vmatpush3.bf16.msra.mxu0 %v9764_v52  ;;  %v11040_v52 = vand.u32 4294901760, %v4198_v27 }
 0x72b   :  { %9766 = vmatprep.subr.bf16.mxu0 %v10390_v0 }
 0x72c   :  { %v11053_v20 = vsub.f32 %v4198_v27, %v11040_v52  ;;  %v7812_v27 = vld [vmem:[#allocation4 + $0x8] ss:$0 sm:$0xff] }
 0x72e   :  { %9768 = vmatpush3.bf16.msra.mxu0 %v9767_v7  ;;  %v4285_v7 = vand.u32 4294901760, %v4284_v5  ;;  %v11056_v24 = vand.u32 4294901760, %v11053_v20 }
 0x72f   :  { %9769 = vmatprep.subr.bf16.mxu0 %v10390_v0 }
 0x730   :  { %v4286_v10 = vsub.f32 %v4284_v5, %v4285_v7  ;;  %v11049_v4 = vpack.c.bf16 %v4292_v57, %v4285_v7  ;;  %v7813_v7 = vld [vmem:[#allocation4 + $0x9] ss:$0 sm:$0xff] }
 0x731   :  { %8872 = vmatmul.mubr.f32.vlgmr.msra.gmra.mrb[8].mxu0 %v3242_v21 }
 0x732   :  { %9771 = vmatpush3.bf16.msra.mxu0 %v10887_v8  ;;  %8890 = vmatprep.mubr.msk.f32.mxu0 %vm10391_vm0, %v10392_v1  ;;  %v3707_v8 = vld [vmem:[%s11521_s7 + $0x8] sm:$0xff]  ;;  %v4287_v12 = vand.u32 4294901760, %v4286_v10 }
 0x733   :  { %9772 = vmatprep.subr.bf16.mxu0 %v10390_v0  ;;  %v3728_v28 = vand.u32 4294901760, %v3707_v8 }
 0x734   :  { %v11045_v14 = vpack.c.bf16 %v4294_v13, %v4287_v12 }
 0x735   :  { %v3811_v32 = vsub.f32 %v3707_v8, %v3728_v28 }
 0x736   :  { %9774 = vmatpush3.bf16.msra.mxu0 %v10913_v22  ;;  %v3725_v22 = vand.u32 4294901760, %v3706_v59 }
 0x737   :  { %9775 = vmatprep.subr.bf16.mxu0 %v10390_v0  ;;  %v3812_v35 = vand.u32 4294901760, %v3811_v32 }
 0x738   :  { %v3804_v30 = vsub.f32 %v3706_v59, %v3725_v22  ;;  %v4300_v59 = vsub.f32 %v11053_v20, %v11056_v24 }
 0x739   :  { %v3813_v38 = vsub.f32 %v3811_v32, %v3812_v35 }
 0x73a   :  { %9777 = vmatpush3.bf16.msra.mxu0 %v10926_v29  ;;  %v9782_v29 = vpack.c.bf16 %v3728_v28, %v3725_v22  ;;  %v3805_v34 = vand.u32 4294901760, %v3804_v30  ;;  %v9788_v42 = vpack.c.bf16 %v3811_v32, %v3804_v30  ;;  %v4301_v22 = vand.u32 4294901760, %v4300_v59  ;;  %v5660_v59 = vld [vmem:[%s11524_s10 + $0x28] sm:$0xff] }
 0x73b   :  { %9778 = vmatprep.subr.bf16.mxu0 %v10390_v0  ;;  %v3814_v40 = vand.u32 4294901760, %v3813_v38  ;;  %v5170_v38 = vld [vmem:[#allocation9] sm:$0xff] }
 0x73c   :  { %9783 = vmatpush3.bf16.msra.mxu1 %v9782_v29  ;;  %v3806_v37 = vsub.f32 %v3804_v30, %v3805_v34  ;;  %v9794_v43 = vpack.c.bf16 %v3812_v35, %v3805_v34 }
 0x73d   :  { %8897 = vmatprep.subr.mxu1 %v10392_v1 }
 0x73e   :  { %9780 = vmatpush3.bf16.msra.mxu0 %v10932_v31  ;;  %v3708_v31 = vld [vmem:[%s11521_s7 + $0x10] sm:$0xf]  ;;  %v3807_v39 = vand.u32 4294901760, %v3806_v37 }
 0x73f   :  { %9835 = vmatprep.subr.bf16.mxu0 %v10390_v0  ;;  %v3722_v33 = vsel %vm3720_vm4, %v3708_v31, 0 }
 0x740   :  { %v3731_v36 = vand.u32 4294901760, %v3722_v33  ;;  %v9785_v41 = vpack.c.bf16 %v3814_v40, %v3807_v39  ;;  %v5171_v39 = vld [vmem:[#allocation9 + $0x8] sm:$0xff]  ;;  %v5184_v40 = vand.u32 4294901760, %v5170_v38 }
 0x741   :  { %8891 = vmatmul.mubr.f32.vlgmr.msra.gmra.mrb[8].mxu0 %v3242_v21 }
 0x742   :  { %9061 = vmatprep.mubr.msk.f32.mxu0 %vm10391_vm0, %v10392_v1  ;;  %8898 = vmatpush3.msra.mxu1 %v3731_v36  ;;  %v3818_v49 = vsub.f32 %v3722_v33, %v3731_v36 }
 0x743   :  { %9784 = vmatprep.subr.bf16.mxu1 %v10390_v0 }
 0x744   :  { %v3819_v53 = vand.u32 4294901760, %v3818_v49 }
 0x746   :  { %v3820_v56 = vsub.f32 %v3818_v49, %v3819_v53 }
 0x748   :  { %v3821_v60 = vand.u32 4294901760, %v3820_v56 }
 0x814   :  { %v3702_v45 = vpop.f32.mrb[8].mxu0 }
 0x815   :  { %v10092_v46 = vadd.f32 %v7810_v44, %v3702_v45  ;;  %v8892_v47 = vpop.f32.mrb[9].mxu0  ;;  %v5263_v44 = vsub.f32 %v5170_v38, %v5184_v40 }
 0x817   :  { %v3718_v48 = vsel %vm3716_vm5, %v10092_v46, 0  ;;  %v5264_v47 = vand.u32 4294901760, %v5263_v44 }
 0x818   :  { %v3792_v50 = vand.u32 4294901760, %v3718_v48 }
 0x81a   :  { %v3793_v51 = vsub.f32 %v3718_v48, %v3792_v50 }
 0x81c   :  { %v3794_v54 = vand.u32 4294901760, %v3793_v51 }
 0x81e   :  { %v3795_v55 = vsub.f32 %v3793_v51, %v3794_v54 }
 0x820   :  { %v3796_v58 = vand.u32 4294901760, %v3795_v55 }
 0x822   :  { %8900 = vmatmul.mubr.f32.vlgmr.msra.gmra.mrb[6].mxu1 %v3796_v58  ;;  %v11142_v58 = vld [vmem:[%s11524_s10] sm:$0xff] }
 0x823   :  { %9786 = vmatpush3.bf16.msra.mxu1 %v9785_v41  ;;  %8908 = vmatprep.mubr.msk.f32.mxu1 %vm10391_vm0, %v10392_v1  ;;  %v5187_v41 = vand.u32 4294901760, %v5171_v39  ;;  %v5669_v61 = vand.u32 4294901760, %v11142_v58 }
 0x824   :  { %8906 = vmatprep.subr.mxu1 %v10392_v1 }
 0x825   :  { %v5270_v45 = vsub.f32 %v5171_v39, %v5187_v41 }
 0x827   :  { %8907 = vmatpush3.msra.mxu1 %v3821_v60  ;;  %v5271_v48 = vand.u32 4294901760, %v5270_v45  ;;  %v9842_v55 = vpack.c.bf16 %v5270_v45, %v5263_v44  ;;  %v11147_v60 = vld [vmem:[%s11524_s10 + $0x8] sm:$0xff] }
 0x828   :  { %9787 = vmatprep.subr.bf16.mxu1 %v10390_v0  ;;  %v5672_v62 = vand.u32 4294901760, %v11147_v60 }
 0x829   :  { %v9848_v56 = vpack.c.bf16 %v5271_v48, %v5264_v47 }
 0x82a   :  { %8909 = vmatmul.mubr.f32.vlgmr.msra.gmra.mrb[6].mxu1 %v3792_v50  ;;  %v11155_v63 = vpack.c.bf16 %v5672_v62, %v5669_v61 }
 0x82b   :  { %9789 = vmatpush3.bf16.msra.mxu1 %v9788_v42  ;;  %8917 = vmatprep.mubr.msk.f32.mxu1 %vm10391_vm0, %v10392_v1  ;;  %v5172_v42 = vld [vmem:[#allocation9 + $0x10] sm:$0xff] }
 0x82c   :  { %8915 = vmatprep.subr.mxu1 %v10392_v1  ;;  %v11134_v46 = vand.u32 4294901760, %v5172_v42 }
 0x82e   :  { %v5277_v12 = vsub.f32 %v5172_v42, %v11134_v46 }
 0x82f   :  { %8916 = vmatpush3.msra.mxu1 %v3818_v49  ;;  %v5265_v49 = vsub.f32 %v5263_v44, %v5264_v47 }
 0x830   :  { %9790 = vmatprep.subr.bf16.mxu1 %v10390_v0 }
 0x832   :  { %8918 = vmatmul.mubr.f32.vlgmr.msra.gmra.mrb[6].mxu1 %v3793_v51  ;;  %v5266_v51 = vand.u32 4294901760, %v5265_v49 }
 0x833   :  { %9792 = vmatpush3.bf16.msra.mxu1 %v9782_v29  ;;  %8926 = vmatprep.mubr.msk.f32.mxu1 %vm10391_vm0, %v10392_v1 }
 0x834   :  { %8924 = vmatprep.subr.mxu1 %v10392_v1 }
 0x837   :  { %8925 = vmatpush3.msra.mxu1 %v3731_v36 }
 0x838   :  { %9793 = vmatprep.subr.bf16.mxu1 %v10390_v0 }
 0x83a   :  { %8927 = vmatmul.mubr.f32.vlgmr.msra.gmra.mrb[6].mxu1 %v3794_v54 }
 0x83b   :  { %9795 = vmatpush3.bf16.msra.mxu1 %v9794_v43  ;;  %8935 = vmatprep.mubr.msk.f32.mxu1 %vm10391_vm0, %v10392_v1  ;;  %v11131_v43 = vpack.c.bf16 %v5187_v41, %v5184_v40 }
 0x83c   :  { %8933 = vmatprep.subr.mxu1 %v10392_v1 }
 0x83d   :  { %9837 = vmatpush3.bf16.msra.mxu0 %v11131_v43 }
 0x83e   :  { %9059 = vmatprep.subr.mxu0 %v10392_v1 }
 0x83f   :  { %8934 = vmatpush3.msra.mxu1 %v3819_v53 }
 0x840   :  { %9796 = vmatprep.subr.bf16.mxu1 %v10390_v0 }
 0x841   :  { %9060 = vmatpush3.msra.mxu0 %v11134_v46 }
 0x842   :  { %8936 = vmatmul.mubr.f32.vlgmr.msra.gmra.mrb[6].mxu1 %v3792_v50  ;;  %9838 = vmatprep.subr.bf16.mxu0 %v10390_v0 }
 0x843   :  { %9798 = vmatpush3.bf16.msra.mxu1 %v9782_v29  ;;  %8944 = vmatprep.mubr.msk.f32.mxu1 %vm10391_vm0, %v10392_v1 }
 0x844   :  { %8942 = vmatprep.subr.mxu1 %v10392_v1 }
 0x847   :  { %8943 = vmatpush3.msra.mxu1 %v3731_v36 }
 0x848   :  { %9799 = vmatprep.subr.bf16.mxu1 %v10390_v0 }
 0x84a   :  { %8945 = vmatmul.mubr.f32.vlgmr.msra.gmra.mrb[6].mxu1 %v3792_v50  ;;  %v5272_v50 = vsub.f32 %v5270_v45, %v5271_v48 }
 0x84b   :  { %8953 = vmatprep.mubr.msk.f32.mxu1 %vm10391_vm0, %v10392_v1  ;;  %9801 = vmatpush3.bf16.msra.mxu1 %v11037_v3 }
 0x84c   :  { %8951 = vmatprep.subr.mxu1 %v10392_v1  ;;  %v5273_v53 = vand.u32 4294901760, %v5272_v50 }
 0x84e   :  { %v9839_v54 = vpack.c.bf16 %v5273_v53, %v5266_v51 }
 0x84f   :  { %8952 = vmatpush3.msra.mxu1 %v11040_v52 }
 0x850   :  { %9802 = vmatprep.subr.bf16.mxu1 %v10390_v0 }
 0x91d   :  { %v4192_v16 = vpop.f32.mrb[6].mxu1 }
 0x91e   :  { %v10093_v17 = vadd.f32 %v7811_v15, %v4192_v16  ;;  %v8946_v18 = vpop.f32.mrb[7].mxu1 }
 0x920   :  { %v4202_v19 = vsel %vm586_vm2, %v10093_v17, 0 }
 0x921   :  { %v4272_v21 = vand.u32 4294901760, %v4202_v19 }
 0x923   :  { %v4273_v23 = vsub.f32 %v4202_v19, %v4272_v21 }
 0x925   :  { %v4274_v25 = vand.u32 4294901760, %v4273_v23 }
 0x927   :  { %v4275_v26 = vsub.f32 %v4273_v23, %v4274_v25 }
 0x929   :  { %v4276_v8 = vand.u32 4294901760, %v4275_v26  ;;  %v5659_v26 = vld [vmem:[%s11524_s10 + $0x20] sm:$0xff] }
 0x92b   :  { %8954 = vmatmul.mubr.f32.vlgmr.msra.gmra.mrb[8].mxu1 %v4276_v8  ;;  %v5681_v8 = vand.u32 4294901760, %v5659_v26 }
 0x92c   :  { %9804 = vmatpush3.bf16.msra.mxu1 %v11045_v14  ;;  %8962 = vmatprep.mubr.msk.f32.mxu1 %vm10391_vm0, %v10392_v1 }
 0x92d   :  { %8960 = vmatprep.subr.mxu1 %v10392_v1  ;;  %v5781_v40 = vsub.f32 %v5659_v26, %v5681_v8 }
 0x92f   :  { %v5782_v44 = vand.u32 4294901760, %v5781_v40 }
 0x930   :  { %8961 = vmatpush3.msra.mxu1 %v4301_v22 }
 0x931   :  { %9805 = vmatprep.subr.bf16.mxu1 %v10390_v0  ;;  %v5783_v47 = vsub.f32 %v5781_v40, %v5782_v44 }
 0x933   :  { %8963 = vmatmul.mubr.f32.vlgmr.msra.gmra.mrb[8].mxu1 %v4272_v21  ;;  %v5784_v51 = vand.u32 4294901760, %v5783_v47 }
 0x934   :  { %9807 = vmatpush3.bf16.msra.mxu1 %v11047_v9  ;;  %8971 = vmatprep.mubr.msk.f32.mxu1 %vm10391_vm0, %v10392_v1 }
 0x935   :  { %8969 = vmatprep.subr.mxu1 %v10392_v1 }
 0x938   :  { %8970 = vmatpush3.msra.mxu1 %v11053_v20 }
 0x939   :  { %9808 = vmatprep.subr.bf16.mxu1 %v10390_v0 }
 0x93b   :  { %8972 = vmatmul.mubr.f32.vlgmr.msra.gmra.mrb[8].mxu1 %v4273_v23 }
 0x93c   :  { %9810 = vmatpush3.bf16.msra.mxu1 %v11037_v3  ;;  %8980 = vmatprep.mubr.msk.f32.mxu1 %vm10391_vm0, %v10392_v1 }
 0x93d   :  { %8978 = vmatprep.subr.mxu1 %v10392_v1 }
 0x940   :  { %8979 = vmatpush3.msra.mxu1 %v11040_v52 }
 0x941   :  { %9811 = vmatprep.subr.bf16.mxu1 %v10390_v0 }
 0x943   :  { %8981 = vmatmul.mubr.f32.vlgmr.msra.gmra.mrb[8].mxu1 %v4274_v25 }
 0x944   :  { %9813 = vmatpush3.bf16.msra.mxu1 %v11049_v4  ;;  %8989 = vmatprep.mubr.msk.f32.mxu1 %vm10391_vm0, %v10392_v1 }
 0x945   :  { %8987 = vmatprep.subr.mxu1 %v10392_v1 }
 0x948   :  { %8988 = vmatpush3.msra.mxu1 %v11056_v24 }
 0x949   :  { %9814 = vmatprep.subr.bf16.mxu1 %v10390_v0 }
 0x94b   :  { %8990 = vmatmul.mubr.f32.vlgmr.msra.gmra.mrb[8].mxu1 %v4272_v21 }
 0x94c   :  { %9816 = vmatpush3.bf16.msra.mxu1 %v11037_v3  ;;  %8998 = vmatprep.mubr.msk.f32.mxu1 %vm10391_vm0, %v10392_v1 }
 0x94d   :  { %8996 = vmatprep.subr.mxu1 %v10392_v1 }
 0x950   :  { %8997 = vmatpush3.msra.mxu1 %v11040_v52 }
 0x951   :  { %9817 = vmatprep.subr.bf16.mxu1 %v10390_v0 }
 0x953   :  { %8999 = vmatmul.mubr.f32.vlgmr.msra.gmra.mrb[8].mxu1 %v4272_v21  ;;  %v5658_v21 = vld [vmem:[%s11524_s10 + $0x18] sm:$0xff] }
 0x954   :  { %9819 = vmatpush3.bf16.msra.mxu1 %v11037_v3  ;;  %9007 = vmatprep.mubr.msk.f32.mxu1 %vm10391_vm0, %v10392_v1 }
 0x955   :  { %9005 = vmatprep.subr.mxu1 %v10392_v1 }
 0x958   :  { %9006 = vmatpush3.msra.mxu1 %v11040_v52 }
 0x959   :  { %9820 = vmatprep.subr.bf16.mxu1 %v10390_v0 }
 0xa26   :  { %v4672_v28 = vpop.f32.mrb[8].mxu1 }
 0xa27   :  { %v11095_v29 = vsub.f32 %v10093_v17, %v4672_v28  ;;  %v9000_v30 = vpop.f32.mrb[9].mxu1 }
 0xa28   :  { %v5662_v30 = vld [vmem:[%s11524_s10 + $0x38] sm:$0xff] }
 0xa29   :  { %v4677_v32 = vmul.f32 %v11095_v29, %v11095_v29 }
 0xa2b   :  { %v4679_v31 = vsel %vm586_vm2, %v4677_v32, 0 }
 0xa2c   :  { %v4749_v33 = vand.u32 4294901760, %v4679_v31 }
 0xa2e   :  { %v4750_v34 = vsub.f32 %v4679_v31, %v4749_v33  ;;  %v5690_v31 = vand.u32 4294901760, %v5662_v30 }
 0xa30   :  { %v4751_v35 = vand.u32 4294901760, %v4750_v34  ;;  %v5802_v50 = vsub.f32 %v5662_v30, %v5690_v31 }
 0xa32   :  { %v4752_v36 = vsub.f32 %v4750_v34, %v4751_v35 }
 0xa34   :  { %v4753_v37 = vand.u32 4294901760, %v4752_v36 }
 0xa36   :  { %9008 = vmatmul.mubr.f32.vlgmr.msra.gmra.mrb[10].mxu1 %v4753_v37 }
 0xa37   :  { %9822 = vmatpush3.bf16.msra.mxu1 %v11045_v14  ;;  %9016 = vmatprep.mubr.msk.f32.mxu1 %vm10391_vm0, %v10392_v1 }
 0xa38   :  { %9014 = vmatprep.subr.mxu1 %v10392_v1 }
 0xa3b   :  { %9015 = vmatpush3.msra.mxu1 %v4301_v22  ;;  %v5684_v22 = vand.u32 4294901760, %v5660_v59 }
 0xa3c   :  { %9823 = vmatprep.subr.bf16.mxu1 %v10390_v0 }
 0xa3d   :  { %v11208_v28 = vpack.c.bf16 %v5684_v22, %v5681_v8  ;;  %v5788_v41 = vsub.f32 %v5660_v59, %v5684_v22 }
 0xa3e   :  { %9017 = vmatmul.mubr.f32.vlgmr.msra.gmra.mrb[10].mxu1 %v4749_v33 }
 0xa3f   :  { %9825 = vmatpush3.bf16.msra.mxu1 %v11047_v9  ;;  %9025 = vmatprep.mubr.msk.f32.mxu1 %vm10391_vm0, %v10392_v1  ;;  %v5789_v45 = vand.u32 4294901760, %v5788_v41 }
 0xa40   :  { %9023 = vmatprep.subr.mxu1 %v10392_v1 }
 0xa41   :  { %v5790_v48 = vsub.f32 %v5788_v41, %v5789_v45 }
 0xa43   :  { %9024 = vmatpush3.msra.mxu1 %v11053_v20  ;;  %v5657_v20 = vld [vmem:[%s11524_s10 + $0x10] sm:$0xff]  ;;  %v5791_v53 = vand.u32 4294901760, %v5790_v48  ;;  %v6769_v48 = vld [vmem:[%s11525_s11 + $0x28] sm:$0xff] }
 0xa44   :  { %9826 = vmatprep.subr.bf16.mxu1 %v10390_v0  ;;  %v5675_v23 = vand.u32 4294901760, %v5657_v20 }
 0xa46   :  { %9026 = vmatmul.mubr.f32.vlgmr.msra.gmra.mrb[10].mxu1 %v4750_v34  ;;  %v5767_v34 = vsub.f32 %v5657_v20, %v5675_v23 }
 0xa47   :  { %9828 = vmatpush3.bf16.msra.mxu1 %v11037_v3  ;;  %9034 = vmatprep.mubr.msk.f32.mxu1 %vm10391_vm0, %v10392_v1 }
 0xa48   :  { %9032 = vmatprep.subr.mxu1 %v10392_v1  ;;  %v5768_v36 = vand.u32 4294901760, %v5767_v34 }
 0xa4a   :  { %v5769_v38 = vsub.f32 %v5767_v34, %v5768_v36 }
 0xa4b   :  { %9033 = vmatpush3.msra.mxu1 %v11040_v52 }
 0xa4c   :  { %9829 = vmatprep.subr.bf16.mxu1 %v10390_v0  ;;  %v5770_v42 = vand.u32 4294901760, %v5769_v38 }
 0xa4e   :  { %9035 = vmatmul.mubr.f32.vlgmr.msra.gmra.mrb[10].mxu1 %v4751_v35 }
 0xa4f   :  { %9831 = vmatpush3.bf16.msra.mxu1 %v11049_v4  ;;  %9043 = vmatprep.mubr.msk.f32.mxu1 %vm10391_vm0, %v10392_v1  ;;  %v5278_v4 = vand.u32 4294901760, %v5277_v12 }
 0xa50   :  { %9041 = vmatprep.subr.mxu1 %v10392_v1 }
 0xa51   :  { %v5279_v17 = vsub.f32 %v5277_v12, %v5278_v4 }
 0xa53   :  { %9042 = vmatpush3.msra.mxu1 %v11056_v24  ;;  %v5280_v19 = vand.u32 4294901760, %v5279_v17  ;;  %v5678_v24 = vand.u32 4294901760, %v5658_v21 }
 0xa54   :  { %9832 = vmatprep.subr.bf16.mxu1 %v10390_v0 }
 0xa55   :  { %v11196_v25 = vpack.c.bf16 %v5678_v24, %v5675_v23  ;;  %v5774_v35 = vsub.f32 %v5658_v21, %v5678_v24 }
 0xa56   :  { %9044 = vmatmul.mubr.f32.vlgmr.msra.gmra.mrb[10].mxu1 %v4749_v33 }
 0xa57   :  { %9834 = vmatpush3.bf16.msra.mxu1 %v11037_v3  ;;  %9052 = vmatprep.mubr.msk.f32.mxu1 %vm10391_vm0, %v10392_v1  ;;  %v5775_v37 = vand.u32 4294901760, %v5774_v35 }
 0xa58   :  { %9050 = vmatprep.subr.mxu1 %v10392_v1 }
 0xa59   :  { %v5776_v39 = vsub.f32 %v5774_v35, %v5775_v37 }
 0xa5b   :  { %9051 = vmatpush3.msra.mxu1 %v11040_v52 }
 0xa5c   :  { %9853 = vmatprep.subr.bf16.mxu1 %v10390_v0 }
 0xa5e   :  { %9053 = vmatmul.mubr.f32.vlgmr.msra.gmra.mrb[10].mxu1 %v4749_v33 }
 0xa5f   :  { %9125 = vmatprep.mubr.msk.f32.mxu1 %vm10391_vm0, %v10392_v1  ;;  %9855 = vmatpush3.bf16.msra.mxu1 %v11155_v63 }
 0xa60   :  { %9856 = vmatprep.subr.bf16.mxu1 %v10390_v0 }
 0xa63   :  { %9858 = vmatpush3.bf16.msra.mxu1 %v11196_v25 }
 0xa64   :  { %9859 = vmatprep.subr.bf16.mxu1 %v10390_v0 }
 0xa67   :  { %9861 = vmatpush3.bf16.msra.mxu1 %v11208_v28 }
 0xa68   :  { %9862 = vmatprep.subr.bf16.mxu1 %v10390_v0 }
 0xb31   :  { %v5149_v2 = vpop.f32.mrb[10].mxu1 }
 0xb32   :  { %v10094_v3 = vadd.f32 1e-05, %v5149_v2  ;;  %v9054_v5 = vpop.f32.mrb[11].mxu1 }
 0xb34   :  { %10261 = vrsqrt.f32 %v10094_v3 }
 0xb3e   :  { %v10262_v6 = vpop.eup %10261 }
 0xb3f   :  { %v5154_v52 = vmul.f32 %v10262_v6, %v11095_v29  ;;  %v5661_v29 = vld [vmem:[%s11524_s10 + $0x30] sm:$0xff] }
 0xb40   :  { %v5687_v32 = vand.u32 4294901760, %v5661_v29 }
 0xb41   :  { %v5161_v57 = vmul.f32 %v7812_v27, %v5154_v52  ;;  %v11232_v52 = vpack.c.bf16 %v5774_v35, %v5767_v34 }
 0xb42   :  { %v11220_v33 = vpack.c.bf16 %v5690_v31, %v5687_v32  ;;  %v5795_v49 = vsub.f32 %v5661_v29, %v5687_v32 }
 0xb43   :  { %v5168_v10 = vadd.f32 %v7813_v7, %v5161_v57  ;;  %v11234_v7 = vpack.c.bf16 %v5788_v41, %v5781_v40 }
 0xb44   :  { %9864 = vmatpush3.bf16.msra.mxu1 %v11220_v33  ;;  %v11236_v57 = vpack.c.bf16 %v5802_v50, %v5795_v49 }
 0xb45   :  { %v5169_v11 = vmax.f32 %v5168_v10, 0.0  ;;  %9865 = vmatprep.subr.bf16.mxu1 %v10390_v0  ;;  %v11238_v10 = vpack.c.bf16 %v5775_v37, %v5768_v36 }
 0xb47   :  { %v5181_v13 = vsel %vm586_vm2, %v5169_v11, 0  ;;  %v11240_v11 = vpack.c.bf16 %v5789_v45, %v5782_v44  ;;  %v6767_v44 = vld [vmem:[%s11525_s11 + $0x18] sm:$0xff]  ;;  %v6768_v45 = vld [vmem:[%s11525_s11 + $0x20] sm:$0xff] }
 0xb48   :  { %v5251_v14 = vand.u32 4294901760, %v5181_v13  ;;  %v6792_v47 = vand.u32 4294901760, %v6767_v44 }
 0xb4a   :  { %v5252_v9 = vsub.f32 %v5181_v13, %v5251_v14  ;;  %v5753_v13 = vsub.f32 %v11142_v58, %v5669_v61 }
 0xb4c   :  { %v5253_v15 = vand.u32 4294901760, %v5252_v9 }
 0xb4e   :  { %v5254_v16 = vsub.f32 %v5252_v9, %v5253_v15 }
 0xb50   :  { %v5255_v18 = vand.u32 4294901760, %v5254_v16 }
 0xb52   :  { %9062 = vmatmul.mubr.f32.vlgmr.msra.gmra.mrb[10].mxu0 %v5255_v18 }
 0xb53   :  { %9840 = vmatpush3.bf16.msra.mxu0 %v9839_v54  ;;  %9070 = vmatprep.mubr.msk.f32.mxu0 %vm10391_vm0, %v10392_v1  ;;  %v5796_v54 = vand.u32 4294901760, %v5795_v49 }
 0xb54   :  { %9068 = vmatprep.subr.mxu0 %v10392_v1 }
 0xb55   :  { %v5797_v2 = vsub.f32 %v5795_v49, %v5796_v54  ;;  %v6795_v49 = vand.u32 4294901760, %v6768_v45 }
 0xb57   :  { %9069 = vmatpush3.msra.mxu0 %v5280_v19  ;;  %v5798_v5 = vand.u32 4294901760, %v5797_v2 }
 0xb58   :  { %9841 = vmatprep.subr.bf16.mxu0 %v10390_v0 }
 0xb5a   :  { %9071 = vmatmul.mubr.f32.vlgmr.msra.gmra.mrb[10].mxu0 %v5251_v14 }
 0xb5b   :  { %9843 = vmatpush3.bf16.msra.mxu0 %v9842_v55  ;;  %9079 = vmatprep.mubr.msk.f32.mxu0 %vm10391_vm0, %v10392_v1  ;;  %v5803_v55 = vand.u32 4294901760, %v5802_v50 }
 0xb5c   :  { %9077 = vmatprep.subr.mxu0 %v10392_v1 }
 0xb5d   :  { %v5804_v3 = vsub.f32 %v5802_v50, %v5803_v55  ;;  %v6770_v50 = vld [vmem:[%s11525_s11 + $0x30] sm:$0xff] }
 0xb5f   :  { %9078 = vmatpush3.msra.mxu0 %v5277_v12  ;;  %v5805_v6 = vand.u32 4294901760, %v5804_v3  ;;  %v11242_v12 = vpack.c.bf16 %v5803_v55, %v5796_v54  ;;  %v6801_v54 = vand.u32 4294901760, %v6770_v50  ;;  %v11406_v3 = vsub.f32 %v6767_v44, %v6792_v47 }
 0xb60   :  { %9844 = vmatprep.subr.bf16.mxu0 %v10390_v0 }
 0xb61   :  { %v11230_v27 = vpack.c.bf16 %v5805_v6, %v5798_v5  ;;  %v11408_v5 = vsub.f32 %v6768_v45, %v6795_v49 }
 0xb62   :  { %9080 = vmatmul.mubr.f32.vlgmr.msra.gmra.mrb[10].mxu0 %v5252_v9  ;;  %v7814_v9 = vld [vmem:[#allocation4 + $0xa] ss:$0 sm:$0xff] }
 0xb63   :  { %9846 = vmatpush3.bf16.msra.mxu0 %v11131_v43  ;;  %9088 = vmatprep.mubr.msk.f32.mxu0 %vm10391_vm0, %v10392_v1 }
 0xb64   :  { %9086 = vmatprep.subr.mxu0 %v10392_v1 }
 0xb67   :  { %9087 = vmatpush3.msra.mxu0 %v11134_v46 }
 0xb68   :  { %9847 = vmatprep.subr.bf16.mxu0 %v10390_v0 }
 0xb6a   :  { %9089 = vmatmul.mubr.f32.vlgmr.msra.gmra.mrb[10].mxu0 %v5253_v15 }
 0xb6b   :  { %9849 = vmatpush3.bf16.msra.mxu0 %v9848_v56  ;;  %9097 = vmatprep.mubr.msk.f32.mxu0 %vm10391_vm0, %v10392_v1  ;;  %v11228_v56 = vpack.c.bf16 %v5791_v53, %v5784_v51  ;;  %v6771_v51 = vld [vmem:[%s11525_s11 + $0x38] sm:$0xff]  ;;  %v6798_v53 = vand.u32 4294901760, %v6769_v48 }
 0xb6c   :  { %9095 = vmatprep.subr.mxu0 %v10392_v1  ;;  %v6804_v55 = vand.u32 4294901760, %v6771_v51 }
 0xb6d   :  { %v11410_v6 = vsub.f32 %v6769_v48, %v6798_v53 }
 0xb6f   :  { %9096 = vmatpush3.msra.mxu0 %v5278_v4  ;;  %v5754_v4 = vand.u32 4294901760, %v5753_v13 }
 0xb70   :  { %9850 = vmatprep.subr.bf16.mxu0 %v10390_v0 }
 0xb71   :  { %v5755_v20 = vsub.f32 %v5753_v13, %v5754_v4 }
 0xb72   :  { %9098 = vmatmul.mubr.f32.vlgmr.msra.gmra.mrb[10].mxu0 %v5251_v14 }
 0xb73   :  { %9852 = vmatpush3.bf16.msra.mxu0 %v11131_v43  ;;  %9106 = vmatprep.mubr.msk.f32.mxu0 %vm10391_vm0, %v10392_v1  ;;  %v5777_v43 = vand.u32 4294901760, %v5776_v39  ;;  %v5756_v26 = vand.u32 4294901760, %v5755_v20 }
 0xb74   :  { %9104 = vmatprep.subr.mxu0 %v10392_v1 }
 0xb77   :  { %9105 = vmatpush3.msra.mxu0 %v11134_v46  ;;  %v11226_v46 = vpack.c.bf16 %v5777_v43, %v5770_v42  ;;  %v6766_v43 = vld [vmem:[%s11525_s11 + $0x10] sm:$0xff] }
 0xb78   :  { %9925 = vmatprep.subr.bf16.mxu0 %v10390_v0 }
 0xb7a   :  { %9107 = vmatmul.mubr.f32.vlgmr.msra.gmra.mrb[10].mxu0 %v5251_v14  ;;  %v5760_v14 = vsub.f32 %v11147_v60, %v5672_v62 }
 0xb7b   :  { %9927 = vmatpush3.bf16.msra.mxu0 %v11155_v63  ;;  %9239 = vmatprep.mubr.msk.f32.mxu0 %vm10391_vm0, %v10392_v1 }
 0xb7c   :  { %9928 = vmatprep.subr.bf16.mxu0 %v10390_v0  ;;  %v5761_v15 = vand.u32 4294901760, %v5760_v14  ;;  %v11265_v62 = vpack.c.bf16 %v5760_v14, %v5753_v13 }
 0xb7e   :  { %v5762_v21 = vsub.f32 %v5760_v14, %v5761_v15  ;;  %v11287_v22 = vpack.c.bf16 %v5761_v15, %v5754_v4  ;;  %v6889_v15 = vand.u32 4294901760, %v11406_v3 }
 0xb7f   :  { %9930 = vmatpush3.bf16.msra.mxu0 %v11196_v25 }
 0xb80   :  { %9931 = vmatprep.subr.bf16.mxu0 %v10390_v0  ;;  %v5763_v58 = vand.u32 4294901760, %v5762_v21  ;;  %v6896_v21 = vand.u32 4294901760, %v11408_v5 }
 0xb82   :  { %v11254_v8 = vpack.c.bf16 %v5763_v58, %v5756_v26  ;;  %v6897_v26 = vsub.f32 %v11408_v5, %v6896_v21 }
 0xb83   :  { %9933 = vmatpush3.bf16.msra.mxu0 %v11208_v28 }
 0xb84   :  { %9934 = vmatprep.subr.bf16.mxu0 %v10390_v0 }
 0xb87   :  { %9936 = vmatpush3.bf16.msra.mxu0 %v11220_v33 }
 0xb88   :  { %9937 = vmatprep.subr.bf16.mxu0 %v10390_v0 }
 0xc4d   :  { %v5651_v16 = vpop.f32.mrb[10].mxu0 }
 0xc4e   :  { %v11250_v17 = vadd.f32 %v7814_v9, %v5651_v16  ;;  %v9108_v18 = vpop.f32.mrb[11].mxu0 }
 0xc4f   :  { %v6890_v18 = vsub.f32 %v11406_v3, %v6889_v15 }
 0xc50   :  { %v5666_v19 = vsel %vm2051_vm3, %v11250_v17, 0 }
 0xc51   :  { %v5741_v23 = vand.u32 4294901760, %v5666_v19  ;;  %v6891_v20 = vand.u32 4294901760, %v6890_v18 }
 0xc53   :  { %v5742_v24 = vsub.f32 %v5666_v19, %v5741_v23 }
 0xc55   :  { %v5743_v61 = vand.u32 4294901760, %v5742_v24 }
 0xc57   :  { %v5744_v59 = vsub.f32 %v5742_v24, %v5743_v61 }
 0xc59   :  { %v5745_v60 = vand.u32 4294901760, %v5744_v59 }
 0xc5b   :  { %9126 = vmatmul.mubr.f32.vlgmr.msra.gmra.mrb[12].mxu1 %v5745_v60 }
 0xc5c   :  { %9867 = vmatpush3.bf16.msra.mxu1 %v11254_v8  ;;  %9144 = vmatprep.mubr.msk.f32.mxu1 %vm10391_vm0, %v10392_v1 }
 0xc5d   :  { %9868 = vmatprep.subr.bf16.mxu1 %v10390_v0 }
 0xc60   :  { %9870 = vmatpush3.bf16.msra.mxu1 %v11226_v46 }
 0xc61   :  { %9871 = vmatprep.subr.bf16.mxu1 %v10390_v0 }
 0xc64   :  { %9873 = vmatpush3.bf16.msra.mxu1 %v11228_v56 }
 0xc65   :  { %9874 = vmatprep.subr.bf16.mxu1 %v10390_v0 }
 0xc68   :  { %9876 = vmatpush3.bf16.msra.mxu1 %v11230_v27 }
 0xc69   :  { %9877 = vmatprep.subr.bf16.mxu1 %v10390_v0 }
 0xc6b   :  { %9145 = vmatmul.mubr.f32.vlgmr.msra.gmra.mrb[12].mxu1 %v5741_v23 }
 0xc6c   :  { %9879 = vmatpush3.bf16.msra.mxu1 %v11265_v62  ;;  %9163 = vmatprep.mubr.msk.f32.mxu1 %vm10391_vm0, %v10392_v1 }
 0xc6d   :  { %9880 = vmatprep.subr.bf16.mxu1 %v10390_v0 }
 0xc70   :  { %9882 = vmatpush3.bf16.msra.mxu1 %v11232_v52 }
 0xc71   :  { %9883 = vmatprep.subr.bf16.mxu1 %v10390_v0 }
 0xc74   :  { %9885 = vmatpush3.bf16.msra.mxu1 %v11234_v7 }
 0xc75   :  { %9886 = vmatprep.subr.bf16.mxu1 %v10390_v0 }
 0xc78   :  { %9888 = vmatpush3.bf16.msra.mxu1 %v11236_v57 }
 0xc79   :  { %9889 = vmatprep.subr.bf16.mxu1 %v10390_v0 }
 0xc7b   :  { %9164 = vmatmul.mubr.f32.vlgmr.msra.gmra.mrb[12].mxu1 %v5742_v24 }
 0xc7c   :  { %9891 = vmatpush3.bf16.msra.mxu1 %v11155_v63  ;;  %9182 = vmatprep.mubr.msk.f32.mxu1 %vm10391_vm0, %v10392_v1 }
 0xc7d   :  { %9892 = vmatprep.subr.bf16.mxu1 %v10390_v0 }
 0xc80   :  { %9894 = vmatpush3.bf16.msra.mxu1 %v11196_v25 }
 0xc81   :  { %9895 = vmatprep.subr.bf16.mxu1 %v10390_v0 }
 0xc84   :  { %9897 = vmatpush3.bf16.msra.mxu1 %v11208_v28 }
 0xc85   :  { %9898 = vmatprep.subr.bf16.mxu1 %v10390_v0 }
 0xc88   :  { %9900 = vmatpush3.bf16.msra.mxu1 %v11220_v33 }
 0xc89   :  { %9901 = vmatprep.subr.bf16.mxu1 %v10390_v0 }
 0xc8b   :  { %9183 = vmatmul.mubr.f32.vlgmr.msra.gmra.mrb[12].mxu1 %v5743_v61  ;;  %v6898_v61 = vand.u32 4294901760, %v6897_v26 }
 0xc8c   :  { %9903 = vmatpush3.bf16.msra.mxu1 %v11287_v22  ;;  %9201 = vmatprep.mubr.msk.f32.mxu1 %vm10391_vm0, %v10392_v1 }
 0xc8d   :  { %9904 = vmatprep.subr.bf16.mxu1 %v10390_v0 }
 0xc90   :  { %9906 = vmatpush3.bf16.msra.mxu1 %v11238_v10 }
 0xc91   :  { %9907 = vmatprep.subr.bf16.mxu1 %v10390_v0 }
 0xc94   :  { %9909 = vmatpush3.bf16.msra.mxu1 %v11240_v11 }
 0xc95   :  { %9910 = vmatprep.subr.bf16.mxu1 %v10390_v0 }
 0xc98   :  { %9912 = vmatpush3.bf16.msra.mxu1 %v11242_v12 }
 0xc99   :  { %9913 = vmatprep.subr.bf16.mxu1 %v10390_v0 }
 0xc9b   :  { %9202 = vmatmul.mubr.f32.vlgmr.msra.gmra.mrb[12].mxu1 %v5741_v23 }
 0xc9c   :  { %9915 = vmatpush3.bf16.msra.mxu1 %v11155_v63  ;;  %9220 = vmatprep.mubr.msk.f32.mxu1 %vm10391_vm0, %v10392_v1 }
 0xc9d   :  { %9916 = vmatprep.subr.bf16.mxu1 %v10390_v0 }
 0xca0   :  { %9918 = vmatpush3.bf16.msra.mxu1 %v11196_v25 }
 0xca1   :  { %9919 = vmatprep.subr.bf16.mxu1 %v10390_v0 }
 0xca4   :  { %9921 = vmatpush3.bf16.msra.mxu1 %v11208_v28 }
 0xca5   :  { %9922 = vmatprep.subr.bf16.mxu1 %v10390_v0 }
 0xca8   :  { %9924 = vmatpush3.bf16.msra.mxu1 %v11220_v33 }
 0xca9   :  { %9997 = vmatprep.subr.bf16.mxu1 %v10390_v0 }
 0xcab   :  { %9221 = vmatmul.mubr.f32.vlgmr.msra.gmra.mrb[12].mxu1 %v5741_v23  ;;  %v6903_v23 = vand.u32 4294901760, %v11410_v6 }
 0xcac   :  { %9353 = vmatprep.mubr.msk.f32.mxu1 %vm10391_vm0, %v10392_v1 }
 0xcad   :  { %v6904_v58 = vsub.f32 %v11410_v6, %v6903_v23 }
 0xcaf   :  { %v6905_v59 = vand.u32 4294901760, %v6904_v58  ;;  %v7818_v58 = vld [vmem:[#allocation4 + $0xe] ss:$0 sm:$0xff] }
 0xd7e   :  { %v6201_v29 = vpop.f32.mrb[12].mxu1 }
 0xd7f   :  { %v11313_v30 = vsub.f32 %v11250_v17, %v6201_v29  ;;  %v9222_v32 = vpop.f32.mrb[13].mxu1 }
 0xd81   :  { %v6206_v31 = vmul.f32 %v11313_v30, %v11313_v30 }
 0xd83   :  { %v6208_v34 = vsel %vm2051_vm3, %v6206_v31, 0 }
 0xd84   :  { %v6283_v35 = vand.u32 4294901760, %v6208_v34 }
 0xd86   :  { %v6284_v36 = vsub.f32 %v6208_v34, %v6283_v35 }
 0xd88   :  { %v6285_v37 = vand.u32 4294901760, %v6284_v36 }
 0xd8a   :  { %v6286_v38 = vsub.f32 %v6284_v36, %v6285_v37 }
 0xd8c   :  { %v6287_v39 = vand.u32 4294901760, %v6286_v38 }
 0xd8e   :  { %9240 = vmatmul.mubr.f32.vlgmr.msra.gmra.mrb[12].mxu0 %v6287_v39 }
 0xd8f   :  { %9939 = vmatpush3.bf16.msra.mxu0 %v11254_v8  ;;  %9258 = vmatprep.mubr.msk.f32.mxu0 %vm10391_vm0, %v10392_v1 }
 0xd90   :  { %9940 = vmatprep.subr.bf16.mxu0 %v10390_v0 }
 0xd93   :  { %9942 = vmatpush3.bf16.msra.mxu0 %v11226_v46  ;;  %v6789_v46 = vand.u32 4294901760, %v6766_v43 }
 0xd94   :  { %9943 = vmatprep.subr.bf16.mxu0 %v10390_v0 }
 0xd95   :  { %v11404_v2 = vsub.f32 %v6766_v43, %v6789_v46 }
 0xd97   :  { %9945 = vmatpush3.bf16.msra.mxu0 %v11228_v56  ;;  %v11402_v56 = vpack.c.bf16 %v6792_v47, %v6789_v46  ;;  %v6882_v4 = vand.u32 4294901760, %v11404_v2  ;;  %v7815_v46 = vld [vmem:[#allocation4 + $0xb] ss:$0 sm:$0xff] }
 0xd98   :  { %9946 = vmatprep.subr.bf16.mxu0 %v10390_v0 }
 0xd99   :  { %v6883_v17 = vsub.f32 %v11404_v2, %v6882_v4 }
 0xd9b   :  { %9948 = vmatpush3.bf16.msra.mxu0 %v11230_v27  ;;  %v11412_v27 = vsub.f32 %v6770_v50, %v6801_v54  ;;  %v6884_v19 = vand.u32 4294901760, %v6883_v17 }
 0xd9c   :  { %9949 = vmatprep.subr.bf16.mxu0 %v10390_v0 }
 0xd9d   :  { %v10013_v24 = vpack.c.bf16 %v6891_v20, %v6884_v19  ;;  %v6910_v8 = vand.u32 4294901760, %v11412_v27 }
 0xd9e   :  { %9259 = vmatmul.mubr.f32.vlgmr.msra.gmra.mrb[12].mxu0 %v6283_v35 }
 0xd9f   :  { %9951 = vmatpush3.bf16.msra.mxu0 %v11265_v62  ;;  %9277 = vmatprep.mubr.msk.f32.mxu0 %vm10391_vm0, %v10392_v1  ;;  %v10016_v62 = vpack.c.bf16 %v6905_v59, %v6898_v61 }
 0xda0   :  { %9952 = vmatprep.subr.bf16.mxu0 %v10390_v0 }
 0xda3   :  { %9954 = vmatpush3.bf16.msra.mxu0 %v11232_v52  ;;  %v11415_v52 = vpack.c.bf16 %v6798_v53, %v6795_v49 }
 0xda4   :  { %9955 = vmatprep.subr.bf16.mxu0 %v10390_v0 }
 0xda7   :  { %9957 = vmatpush3.bf16.msra.mxu0 %v11234_v7  ;;  %v11417_v7 = vsub.f32 %v6771_v51, %v6804_v55 }
 0xda8   :  { %9958 = vmatprep.subr.bf16.mxu0 %v10390_v0 }
 0xda9   :  { %v6917_v60 = vand.u32 4294901760, %v11417_v7  ;;  %v10031_v38 = vpack.c.bf16 %v11417_v7, %v11412_v27 }
 0xdab   :  { %9960 = vmatpush3.bf16.msra.mxu0 %v11236_v57  ;;  %v11421_v57 = vpack.c.bf16 %v6804_v55, %v6801_v54  ;;  %v6918_v29 = vsub.f32 %v11417_v7, %v6917_v60 }
 0xdac   :  { %9961 = vmatprep.subr.bf16.mxu0 %v10390_v0 }
 0xdad   :  { %v6919_v31 = vand.u32 4294901760, %v6918_v29 }
 0xdae   :  { %9278 = vmatmul.mubr.f32.vlgmr.msra.gmra.mrb[12].mxu0 %v6284_v36  ;;  %v10025_v36 = vpack.c.bf16 %v11406_v3, %v11404_v2 }
 0xdaf   :  { %9963 = vmatpush3.bf16.msra.mxu0 %v11155_v63  ;;  %9296 = vmatprep.mubr.msk.f32.mxu0 %vm10391_vm0, %v10392_v1 }
 0xdb0   :  { %9964 = vmatprep.subr.bf16.mxu0 %v10390_v0 }
 0xdb3   :  { %9966 = vmatpush3.bf16.msra.mxu0 %v11196_v25 }
 0xdb4   :  { %9967 = vmatprep.subr.bf16.mxu0 %v10390_v0 }
 0xdb7   :  { %9969 = vmatpush3.bf16.msra.mxu0 %v11208_v28 }
 0xdb8   :  { %9970 = vmatprep.subr.bf16.mxu0 %v10390_v0 }
 0xdbb   :  { %9972 = vmatpush3.bf16.msra.mxu0 %v11220_v33 }
 0xdbc   :  { %9973 = vmatprep.subr.bf16.mxu0 %v10390_v0 }
 0xdbe   :  { %9297 = vmatmul.mubr.f32.vlgmr.msra.gmra.mrb[12].mxu0 %v6285_v37  ;;  %v10028_v37 = vpack.c.bf16 %v11410_v6, %v11408_v5 }
 0xdbf   :  { %9975 = vmatpush3.bf16.msra.mxu0 %v11287_v22  ;;  %9315 = vmatprep.mubr.msk.f32.mxu0 %vm10391_vm0, %v10392_v1  ;;  %v6911_v22 = vsub.f32 %v11412_v27, %v6910_v8 }
 0xdc0   :  { %9976 = vmatprep.subr.bf16.mxu0 %v10390_v0 }
 0xdc1   :  { %v6912_v32 = vand.u32 4294901760, %v6911_v22 }
 0xdc3   :  { %9978 = vmatpush3.bf16.msra.mxu0 %v11238_v10  ;;  %v10019_v34 = vpack.c.bf16 %v6919_v31, %v6912_v32 }
 0xdc4   :  { %9979 = vmatprep.subr.bf16.mxu0 %v10390_v0 }
 0xdc7   :  { %9981 = vmatpush3.bf16.msra.mxu0 %v11240_v11 }
 0xdc8   :  { %9982 = vmatprep.subr.bf16.mxu0 %v10390_v0 }
 0xdcb   :  { %9984 = vmatpush3.bf16.msra.mxu0 %v11242_v12 }
 0xdcc   :  { %9985 = vmatprep.subr.bf16.mxu0 %v10390_v0 }
 0xdce   :  { %9316 = vmatmul.mubr.f32.vlgmr.msra.gmra.mrb[12].mxu0 %v6283_v35 }
 0xdcf   :  { %9987 = vmatpush3.bf16.msra.mxu0 %v11155_v63  ;;  %9334 = vmatprep.mubr.msk.f32.mxu0 %vm10391_vm0, %v10392_v1  ;;  %v6764_v63 = vld [vmem:[%s11525_s11] sm:$0xff] }
 0xdd0   :  { %9988 = vmatprep.subr.bf16.mxu0 %v10390_v0  ;;  %v6783_v40 = vand.u32 4294901760, %v6764_v63 }
 0xdd2   :  { %v11378_v42 = vsub.f32 %v6764_v63, %v6783_v40  ;;  %v10049_v63 = vpack.c.bf16 %v6889_v15, %v6882_v4  ;;  %v7817_v15 = vld [vmem:[#allocation4 + $0xd] ss:$0 sm:$0xff] }
 0xdd3   :  { %9990 = vmatpush3.bf16.msra.mxu0 %v11196_v25  ;;  %v6765_v25 = vld [vmem:[%s11525_s11 + $0x8] sm:$0xff] }
 0xdd4   :  { %9991 = vmatprep.subr.bf16.mxu0 %v10390_v0  ;;  %v6868_v10 = vand.u32 4294901760, %v11378_v42 }
 0xdd6   :  { %v6869_v12 = vsub.f32 %v11378_v42, %v6868_v10 }
 0xdd7   :  { %9993 = vmatpush3.bf16.msra.mxu0 %v11208_v28  ;;  %v6786_v28 = vand.u32 4294901760, %v6765_v25 }
 0xdd8   :  { %9994 = vmatprep.subr.bf16.mxu0 %v10390_v0  ;;  %v6870_v14 = vand.u32 4294901760, %v6869_v12 }
 0xdd9   :  { %v11376_v41 = vpack.c.bf16 %v6786_v28, %v6783_v40  ;;  %v10055_v40 = vpack.c.bf16 %v6917_v60, %v6910_v8 }
 0xddb   :  { %9996 = vmatpush3.bf16.msra.mxu0 %v11220_v33  ;;  %v11380_v33 = vsub.f32 %v6765_v25, %v6786_v28  ;;  %9999 = vmatpush3.bf16.msra.mxu1 %v11376_v41  ;;  %v10052_v25 = vpack.c.bf16 %v6903_v23, %v6896_v21 }
 0xddc   :  { %10069 = vmatprep.subr.bf16.mxu0 %v10390_v0  ;;  %10000 = vmatprep.subr.bf16.mxu1 %v10390_v0 }
 0xddd   :  { %v6875_v11 = vand.u32 4294901760, %v11380_v33 }
 0xdde   :  { %9335 = vmatmul.mubr.f32.vlgmr.msra.gmra.mrb[12].mxu0 %v6283_v35  ;;  %v10022_v35 = vpack.c.bf16 %v11380_v33, %v11378_v42 }
 0xddf   :  { %9455 = vmatprep.mubr.msk.f32.mxu0 %vm10391_vm0, %v10392_v1  ;;  %10002 = vmatpush3.bf16.msra.mxu1 %v11402_v56  ;;  %v6876_v13 = vsub.f32 %v11380_v33, %v6875_v11  ;;  %v10046_v39 = vpack.c.bf16 %v6875_v11, %v6868_v10  ;;  %v7816_v33 = vld [vmem:[#allocation4 + $0xc] ss:$0 sm:$0xff] }
 0xde0   :  { %10003 = vmatprep.subr.bf16.mxu1 %v10390_v0 }
 0xde1   :  { %v6877_v9 = vand.u32 4294901760, %v6876_v13 }
 0xde3   :  { %10005 = vmatpush3.bf16.msra.mxu1 %v11415_v52  ;;  %v10010_v16 = vpack.c.bf16 %v6877_v9, %v6870_v14 }
 0xde4   :  { %10006 = vmatprep.subr.bf16.mxu1 %v10390_v0 }
 0xde7   :  { %10008 = vmatpush3.bf16.msra.mxu1 %v11421_v57 }
 0xde8   :  { %10009 = vmatprep.subr.bf16.mxu1 %v10390_v0 }
 0xeb1   :  { %v6743_v28 = vpop.f32.mrb[12].mxu0 }
 0xeb2   :  { %v10096_v43 = vadd.f32 1e-05, %v6743_v28  ;;  %v9336_v44 = vpop.f32.mrb[13].mxu0 }
 0xeb4   :  { %10263 = vrsqrt.f32 %v10096_v43 }
 0xebe   :  { %v10264_v45 = vpop.eup %10263 }
 0xebf   :  { %v6748_v42 = vmul.f32 %v10264_v45, %v11313_v30  ;;  %v7320_v30 = vld [vmem:[%s11526_s12 + $0x8] sm:$0xf] }
 0xec0   :  { %v7333_v3 = vsel %vm3720_vm4, %v7320_v30, 0 }
 0xec1   :  { %v6755_v47 = vmul.f32 %v7815_v46, %v6748_v42  ;;  %v7339_v5 = vand.u32 4294901760, %v7333_v3 }
 0xec3   :  { %v6762_v48 = vadd.f32 %v7816_v33, %v6755_v47 }
 0xec5   :  { %v6763_v49 = vmax.f32 %v6762_v48, 0.0 }
 0xec7   :  { %v6780_v50 = vsel %vm2051_vm3, %v6763_v49, 0 }
 0xec8   :  { %v6855_v51 = vand.u32 4294901760, %v6780_v50 }
 0xeca   :  { %v6856_v53 = vsub.f32 %v6780_v50, %v6855_v51 }
 0xecc   :  { %v6857_v54 = vand.u32 4294901760, %v6856_v53 }
 0xece   :  { %v6858_v55 = vsub.f32 %v6856_v53, %v6857_v54 }
 0xed0   :  { %v6859_v2 = vand.u32 4294901760, %v6858_v55 }
 0xed2   :  { %9354 = vmatmul.mubr.f32.vlgmr.msra.gmra.mrb[14].mxu1 %v6859_v2 }
 0xed3   :  { %10011 = vmatpush3.bf16.msra.mxu1 %v10010_v16  ;;  %9372 = vmatprep.mubr.msk.f32.mxu1 %vm10391_vm0, %v10392_v1 }
 0xed4   :  { %10012 = vmatprep.subr.bf16.mxu1 %v10390_v0 }
 0xed7   :  { %10014 = vmatpush3.bf16.msra.mxu1 %v10013_v24 }
 0xed8   :  { %10015 = vmatprep.subr.bf16.mxu1 %v10390_v0 }
 0xedb   :  { %10017 = vmatpush3.bf16.msra.mxu1 %v10016_v62 }
 0xedc   :  { %10018 = vmatprep.subr.bf16.mxu1 %v10390_v0 }
 0xedf   :  { %10020 = vmatpush3.bf16.msra.mxu1 %v10019_v34 }
 0xee0   :  { %10021 = vmatprep.subr.bf16.mxu1 %v10390_v0 }
 0xee2   :  { %9373 = vmatmul.mubr.f32.vlgmr.msra.gmra.mrb[14].mxu1 %v6855_v51 }
 0xee3   :  { %10023 = vmatpush3.bf16.msra.mxu1 %v10022_v35  ;;  %9391 = vmatprep.mubr.msk.f32.mxu1 %vm10391_vm0, %v10392_v1 }
 0xee4   :  { %10024 = vmatprep.subr.bf16.mxu1 %v10390_v0 }
 0xee7   :  { %10026 = vmatpush3.bf16.msra.mxu1 %v10025_v36 }
 0xee8   :  { %10027 = vmatprep.subr.bf16.mxu1 %v10390_v0 }
 0xeeb   :  { %10029 = vmatpush3.bf16.msra.mxu1 %v10028_v37 }
 0xeec   :  { %10030 = vmatprep.subr.bf16.mxu1 %v10390_v0 }
 0xeef   :  { %10032 = vmatpush3.bf16.msra.mxu1 %v10031_v38 }
 0xef0   :  { %10033 = vmatprep.subr.bf16.mxu1 %v10390_v0 }
 0xef2   :  { %9392 = vmatmul.mubr.f32.vlgmr.msra.gmra.mrb[14].mxu1 %v6856_v53 }
 0xef3   :  { %10035 = vmatpush3.bf16.msra.mxu1 %v11376_v41  ;;  %9410 = vmatprep.mubr.msk.f32.mxu1 %vm10391_vm0, %v10392_v1 }
 0xef4   :  { %10036 = vmatprep.subr.bf16.mxu1 %v10390_v0 }
 0xef7   :  { %10038 = vmatpush3.bf16.msra.mxu1 %v11402_v56 }
 0xef8   :  { %10039 = vmatprep.subr.bf16.mxu1 %v10390_v0 }
 0xefb   :  { %10041 = vmatpush3.bf16.msra.mxu1 %v11415_v52 }
 0xefc   :  { %10042 = vmatprep.subr.bf16.mxu1 %v10390_v0 }
 0xeff   :  { %10044 = vmatpush3.bf16.msra.mxu1 %v11421_v57 }
 0xf00   :  { %10045 = vmatprep.subr.bf16.mxu1 %v10390_v0 }
 0xf02   :  { %9411 = vmatmul.mubr.f32.vlgmr.msra.gmra.mrb[14].mxu1 %v6857_v54 }
 0xf03   :  { %10047 = vmatpush3.bf16.msra.mxu1 %v10046_v39  ;;  %9429 = vmatprep.mubr.msk.f32.mxu1 %vm10391_vm0, %v10392_v1 }
 0xf04   :  { %10048 = vmatprep.subr.bf16.mxu1 %v10390_v0 }
 0xf07   :  { %10050 = vmatpush3.bf16.msra.mxu1 %v10049_v63 }
 0xf08   :  { %10051 = vmatprep.subr.bf16.mxu1 %v10390_v0 }
 0xf0b   :  { %10053 = vmatpush3.bf16.msra.mxu1 %v10052_v25 }
 0xf0c   :  { %10054 = vmatprep.subr.bf16.mxu1 %v10390_v0 }
 0xf0f   :  { %10056 = vmatpush3.bf16.msra.mxu1 %v10055_v40 }
 0xf10   :  { %10057 = vmatprep.subr.bf16.mxu1 %v10390_v0 }
 0xf12   :  { %9430 = vmatmul.mubr.f32.vlgmr.msra.gmra.mrb[14].mxu1 %v6855_v51 }
 0xf13   :  { %10059 = vmatpush3.bf16.msra.mxu1 %v11376_v41  ;;  %9448 = vmatprep.mubr.msk.f32.mxu1 %vm10391_vm0, %v10392_v1  ;;  %v7319_v41 = vld [vmem:[%s11526_s12] sm:$0xff] }
 0xf14   :  { %10060 = vmatprep.subr.bf16.mxu1 %v10390_v0 }
 0xf17   :  { %10062 = vmatpush3.bf16.msra.mxu1 %v11402_v56  ;;  %v7336_v56 = vand.u32 4294901760, %v7319_v41 }
 0xf18   :  { %10063 = vmatprep.subr.bf16.mxu1 %v10390_v0 }
 0xf19   :  { %v10070_v6 = vpack.c.bf16 %v7339_v5, %v7336_v56  ;;  %v7414_v27 = vsub.f32 %v7319_v41, %v7336_v56 }
 0xf1b   :  { %10065 = vmatpush3.bf16.msra.mxu1 %v11415_v52  ;;  %v7421_v52 = vsub.f32 %v7333_v3, %v7339_v5  ;;  %10071 = vmatpush3.bf16.msra.mxu0 %v10070_v6  ;;  %v7415_v7 = vand.u32 4294901760, %v7414_v27 }
 0xf1c   :  { %10066 = vmatprep.subr.bf16.mxu1 %v10390_v0  ;;  %10072 = vmatprep.subr.bf16.mxu0 %v10390_v0 }
 0xf1d   :  { %v7422_v10 = vand.u32 4294901760, %v7421_v52  ;;  %v10076_v9 = vpack.c.bf16 %v7421_v52, %v7414_v27 }
 0xf1f   :  { %10068 = vmatpush3.bf16.msra.mxu1 %v11421_v57  ;;  %v7416_v57 = vsub.f32 %v7414_v27, %v7415_v7  ;;  %v7423_v11 = vsub.f32 %v7421_v52, %v7422_v10  ;;  %v10082_v4 = vpack.c.bf16 %v7422_v10, %v7415_v7 }
 0xf21   :  { %v7417_v12 = vand.u32 4294901760, %v7416_v57  ;;  %v7424_v13 = vand.u32 4294901760, %v7423_v11 }
 0xf22   :  { %9449 = vmatmul.mubr.f32.vlgmr.msra.gmra.mrb[14].mxu1 %v6855_v51 }
 0xf23   :  { %v10073_v14 = vpack.c.bf16 %v7424_v13, %v7417_v12 }
 0xff5   :  { %v7315_v16 = vpop.f32.mrb[14].mxu1 }
 0xff6   :  { %v10097_v17 = vadd.f32 %v7817_v15, %v7315_v16  ;;  %v9450_v18 = vpop.f32.mrb[15].mxu1 }
 0xff8   :  { %v7330_v19 = vsel %vm7328_vm6, %v10097_v17, 0 }
 0xff9   :  { %v7402_v20 = vand.u32 4294901760, %v7330_v19 }
 0xffb   :  { %v7403_v21 = vsub.f32 %v7330_v19, %v7402_v20 }
 0xffd   :  { %v7404_v23 = vand.u32 4294901760, %v7403_v21 }
 0xfff   :  { %v7405_v24 = vsub.f32 %v7403_v21, %v7404_v23 }
0x1001   :  { %v7406_v26 = vand.u32 4294901760, %v7405_v24 }
0x1003   :  { %9456 = vmatmul.mubr.f32.vlgmr.msra.gmra.mrb[14].mxu0 %v7406_v26 }
0x1004   :  { %10074 = vmatpush3.bf16.msra.mxu0 %v10073_v14  ;;  %9462 = vmatprep.mubr.msk.f32.mxu0 %vm10391_vm0, %v10392_v1 }
0x1005   :  { %10075 = vmatprep.subr.bf16.mxu0 %v10390_v0 }
0x100b   :  { %9463 = vmatmul.mubr.f32.vlgmr.msra.gmra.mrb[14].mxu0 %v7402_v20 }
0x100c   :  { %10077 = vmatpush3.bf16.msra.mxu0 %v10076_v9  ;;  %9469 = vmatprep.mubr.msk.f32.mxu0 %vm10391_vm0, %v10392_v1 }
0x100d   :  { %10078 = vmatprep.subr.bf16.mxu0 %v10390_v0 }
0x1013   :  { %9470 = vmatmul.mubr.f32.vlgmr.msra.gmra.mrb[14].mxu0 %v7403_v21 }
0x1014   :  { %10080 = vmatpush3.bf16.msra.mxu0 %v10070_v6  ;;  %9476 = vmatprep.mubr.msk.f32.mxu0 %vm10391_vm0, %v10392_v1 }
0x1015   :  { %10081 = vmatprep.subr.bf16.mxu0 %v10390_v0 }
0x101b   :  { %9477 = vmatmul.mubr.f32.vlgmr.msra.gmra.mrb[14].mxu0 %v7404_v23 }
0x101c   :  { %10083 = vmatpush3.bf16.msra.mxu0 %v10082_v4  ;;  %9483 = vmatprep.mubr.msk.f32.mxu0 %vm10391_vm0, %v10392_v1 }
0x101d   :  { %10084 = vmatprep.subr.bf16.mxu0 %v10390_v0 }
0x1023   :  { %9484 = vmatmul.mubr.f32.vlgmr.msra.gmra.mrb[14].mxu0 %v7402_v20 }
0x1024   :  { %10086 = vmatpush3.bf16.msra.mxu0 %v10070_v6  ;;  %9490 = vmatprep.mubr.msk.f32.mxu0 %vm10391_vm0, %v10392_v1 }
0x102b   :  { %9491 = vmatmul.mubr.f32.vlgmr.msra.gmra.mrb[14].mxu0 %v7402_v20 }
0x10fe   :  { %v7790_v61 = vpop.f32.mrb[14].mxu0 }
0x10ff   :  { %v10098_v59 = vadd.f32 %v7818_v58, %v7790_v61  ;;  %v9492_v8 = vpop.f32.mrb[15].mxu0 }
0x1101   :  { %10265 = vtanh.f32 %v10098_v59 }
0x110b   :  { %v10266_v60 = vpop.eup %10265 }
0x110c   :  { %7796 = vst.msk [vmem:[%s11527_s13] sm:$0xff] %vm7795_vm7, %v10266_v60 }
0x110d   :  { %7801 = vsyncpa [#allocation3], 1 }
0x110e   :  { %7802 = vsyncpa [#allocation5], 1 }
0x110f   :  { %7803 = vsyncpa [#allocation8], 1 }

</bundles_post_ra>
